<compile_context>
chip_gen: v7x
topology: tpu7x:2x2x1
jax: 0.10.0
libtpu: 0.0.40
codegen_flags: <defaults>
</compile_context>

<pallas_src>
import functools

import jax
import jax.numpy as jnp
from jax.experimental import pallas as pl
from jax.experimental.pallas import tpu as pltpu

_VMEM = pl.BlockSpec(memory_space=pltpu.MemorySpace.VMEM)
_SMEM = pl.BlockSpec(memory_space=pltpu.MemorySpace.SMEM)


# ----------------------------------------------------------------------------
# Fused kernel: conv1x1 edge agg -> dense GAT1 -> ReLU -> dense GAT2
#               -> global_mean_pool -> Linear -> ReLU -> LayerNorm -> Linear
# ----------------------------------------------------------------------------
def _fused_kernel(attn_t_ref, w_ref, b_ref, x_ref,
                  g1_w_ref, g1_adst_ref, g1_asrc_ref, g1_ce_ref, g1_b_ref,
                  g2_w_ref, g2_adst_ref, g2_asrc_ref, g2_ce_ref, g2_b_ref,
                  pool_ref, l1w_ref, l1b_ref, lng_ref, lnb_ref, l2w_ref, l2b_ref,
                  out_ref, edge_ref, *, threshold, heads1, heads2):
    n = attn_t_ref.shape[-1]

    # --- 1x1 conv over the 12 channels; attn_t is already (C, dst, src), so
    # --- the accumulate directly yields the (dst, src)-oriented agg matrix.
    aggt = jnp.zeros((n, n), jnp.float32)
    for c in range(attn_t_ref.shape[0]):
        aggt = aggt + attn_t_ref[c] * w_ref[c]
    aggt = aggt + b_ref[0]

    ri = jax.lax.broadcasted_iota(jnp.int32, (n, n), 0)
    ci = jax.lax.broadcasted_iota(jnp.int32, (n, n), 1)
    eye = (ri == ci).astype(jnp.float32)

    mt = (aggt > threshold).astype(jnp.float32)         # edge src->dst, (dst, src)
    edge_ref[...] = aggt * mt                           # dense edge_attr (dst, src)

    # GATConv preprocessing: remove self loops, add self loops (fill='mean')
    offt = mt * (1.0 - eye)
    e_offt = aggt * offt
    cnt = jnp.sum(offt, axis=-1, keepdims=True)         # incoming-edge count per dst
    ssum = jnp.sum(e_offt, axis=-1, keepdims=True)
    self_attr = ssum * pl.reciprocal(jnp.maximum(cnt, 1.0), approx=True)
    maskt = offt + eye                                  # adjacency incl. self loops
    et = e_offt + eye * self_attr                       # dense edge attribute (dst, src)

    def gat(x, wref, adst_ref, asrc_ref, ce_ref, bias_ref, heads, out_relu):
        h_all = jnp.dot(x, wref[...], preferred_element_type=jnp.float32)    # (N, H*C)
        c = h_all.shape[-1] // heads
        # Batched attention coefficients for all heads at once.
        a_dst = jnp.dot(h_all, adst_ref[...],
                        preferred_element_type=jnp.float32)                  # (N, H)
        a_src = jax.lax.dot_general(asrc_ref[...], h_all,
                                    (((1,), (1,)), ((), ())),
                                    preferred_element_type=jnp.float32)      # (H, N)
        outs = []
        for h in range(heads):
            logits = a_dst[:, h:h + 1] + a_src[h:h + 1, :] + et * ce_ref[h]  # (dst, src)
            logits = jnp.where(logits > 0, logits, 0.2 * logits)             # leaky_relu(0.2)
            logits = jnp.where(maskt > 0, logits, jnp.float32(-1e30))        # mask non-edges
            m = jnp.max(logits, axis=-1, keepdims=True)
            p = jnp.exp(logits - m) * maskt
            denom = jnp.sum(p, axis=-1, keepdims=True)
            attn = p * pl.reciprocal(denom, approx=True)                     # softmax per dst
            outs.append(jnp.dot(attn, h_all[:, h * c:(h + 1) * c],
                                preferred_element_type=jnp.float32))
        out = outs[0] if heads == 1 else jnp.concatenate(outs, axis=-1)
        out = out + bias_ref[...]
        if out_relu:
            out = jnp.maximum(out, 0.0)
        return out

    h1 = gat(x_ref[...], g1_w_ref, g1_adst_ref, g1_asrc_ref, g1_ce_ref,
             g1_b_ref, heads1, True)                     # gat1 + F.relu
    h2 = gat(h1, g2_w_ref, g2_adst_ref, g2_asrc_ref, g2_ce_ref,
             g2_b_ref, heads2, False)                    # gat2

    # global_mean_pool + Linear -> ReLU -> LayerNorm -> Linear
    g = jnp.dot(pool_ref[...], h2, preferred_element_type=jnp.float32)
    hh = jnp.dot(g, l1w_ref[...], preferred_element_type=jnp.float32) + l1b_ref[...]
    hh = jnp.maximum(hh, 0.0)
    mu = jnp.mean(hh, axis=-1, keepdims=True)
    var = jnp.mean(jnp.square(hh - mu), axis=-1, keepdims=True)
    hn = (hh - mu) * jax.lax.rsqrt(var + 1e-5)
    hn = hn * lng_ref[...] + lnb_ref[...]
    out_ref[...] = jnp.dot(hn, l2w_ref[...],
                           preferred_element_type=jnp.float32) + l2b_ref[...]


# ----------------------------------------------------------------------------
# Wrapper-side parameter reshaping (traced once; on params, not activations)
# ----------------------------------------------------------------------------
def _block_cols(att):
    """(H, C) -> (H*C, H) block-diagonal: col h carries att[h] in block h."""
    h, c = att.shape
    eye = jnp.eye(h, dtype=att.dtype)
    return (att[:, :, None] * eye[:, None, :]).reshape(h * c, h)


def _block_rows(att):
    """(H, C) -> (H, H*C) block-diagonal: row h carries att[h] in block h."""
    h, c = att.shape
    eye = jnp.eye(h, dtype=att.dtype)
    return (eye[:, :, None] * att[None, :, :]).reshape(h, h * c)


# ----------------------------------------------------------------------------
# Forward pass
# ----------------------------------------------------------------------------
def gat_weight_forward(params, x, attn_tensor, batch_idx, num_graphs,
                       threshold=0.0):
    n = x.shape[0]
    # Free upstream relayout instead of an in-kernel XLU transpose.
    attn_t = jnp.swapaxes(attn_tensor, 1, 2)            # (C, dst, src)

    heads1 = params["g1_att_src"].shape[0]
    heads2 = params["g2_att_src"].shape[0]
    g1_adst = _block_cols(params["g1_att_dst"])
    g1_asrc = _block_rows(params["g1_att_src"])
    g2_adst = _block_cols(params["g2_att_dst"])
    g2_asrc = _block_rows(params["g2_att_src"])

    onehot = (batch_idx[None, :] ==
              jnp.arange(num_graphs, dtype=jnp.int32)[:, None]).astype(jnp.float32)
    counts = jnp.sum(onehot, axis=-1, keepdims=True)
    pool_mat = onehot / jnp.maximum(counts, 1.0)        # global_mean_pool matrix

    bsz = pool_mat.shape[0]
    out_ch = params["lin2_w"].shape[-1]
    kern = functools.partial(_fused_kernel, threshold=threshold,
                             heads1=heads1, heads2=heads2)

    out, edge_t = pl.pallas_call(
        kern,
        out_shape=(
            jax.ShapeDtypeStruct((bsz, out_ch), jnp.float32),   # MLP head output
            jax.ShapeDtypeStruct((n, n), jnp.float32),          # dense edge_attr (dst, src)
        ),
        in_specs=[_VMEM, _SMEM, _SMEM, _VMEM,
                  _VMEM, _VMEM, _VMEM, _SMEM, _VMEM,
                  _VMEM, _VMEM, _VMEM, _SMEM, _VMEM,
                  _VMEM, _VMEM, _VMEM, _VMEM, _VMEM, _VMEM, _VMEM],
        out_specs=(_VMEM, _VMEM),
    )(attn_t, params["agg_w"], params["agg_b"], x,
      params["g1_w"], g1_adst, g1_asrc, params["g1_ce"],
      params["g1_bias"].reshape(1, -1),
      params["g2_w"], g2_adst, g2_asrc, params["g2_ce"],
      params["g2_bias"].reshape(1, -1),
      pool_mat, params["lin1_w"], params["lin1_b"].reshape(1, -1),
      params["ln_g"].reshape(1, -1), params["ln_b"].reshape(1, -1),
      params["lin2_w"], params["lin2_b"].reshape(1, -1))

    # Dense stand-in for the ragged PyTorch edge_attr, in agg_mat (src, dst)
    # orientation.  (Ragged (E,1) gather has no static shape on TPU.)
    edge_attr_dense = edge_t.T
    return out, edge_attr_dense


# ----------------------------------------------------------------------------
# Deterministic parameter init (synthetic; shapes from the module __init__)
# ----------------------------------------------------------------------------
def init_params(key, in_ch, hidden, out_ch, heads):
    ks = jax.random.split(key, 16)
    s = 0.3
    p = {}
    p["agg_w"] = s * jax.random.normal(ks[0], (12,), jnp.float32)       # Conv2d(12,1,1)
    p["agg_b"] = s * jax.random.normal(ks[1], (1,), jnp.float32)
    # gat1: in_ch -> hidden, heads, concat=True, edge_dim=1
    p["g1_w"] = s * jax.random.normal(ks[2], (in_ch, heads * hidden), jnp.float32)
    p["g1_att_src"] = s * jax.random.normal(ks[3], (heads, hidden), jnp.float32)
    p["g1_att_dst"] = s * jax.random.normal(ks[4], (heads, hidden), jnp.float32)
    g1_att_edge = s * jax.random.normal(ks[5], (heads, hidden), jnp.float32)
    g1_lin_edge = s * jax.random.normal(ks[6], (heads, hidden), jnp.float32)
    # scalar edge attr e -> alpha_edge[h] = e * sum_c lin_edge[h,c]*att_edge[h,c]
    p["g1_ce"] = jnp.sum(g1_att_edge * g1_lin_edge, axis=-1)            # (heads,)
    p["g1_bias"] = s * jax.random.normal(ks[7], (heads * hidden,), jnp.float32)
    # gat2: heads*hidden -> hidden, 1 head
    p["g2_w"] = s * jax.random.normal(ks[8], (heads * hidden, hidden), jnp.float32)
    p["g2_att_src"] = s * jax.random.normal(ks[9], (1, hidden), jnp.float32)
    p["g2_att_dst"] = s * jax.random.normal(ks[10], (1, hidden), jnp.float32)
    g2_att_edge = s * jax.random.normal(ks[11], (1, hidden), jnp.float32)
    g2_lin_edge = s * jax.random.normal(ks[12], (1, hidden), jnp.float32)
    p["g2_ce"] = jnp.sum(g2_att_edge * g2_lin_edge, axis=-1)            # (1,)
    p["g2_bias"] = s * jax.random.normal(ks[13], (hidden,), jnp.float32)
    # head MLP: Linear -> ReLU -> LayerNorm -> Linear
    p["lin1_w"] = s * jax.random.normal(ks[14], (hidden, hidden), jnp.float32)
    p["lin1_b"] = jnp.zeros((hidden,), jnp.float32)
    p["ln_g"] = jnp.ones((hidden,), jnp.float32)
    p["ln_b"] = jnp.zeros((hidden,), jnp.float32)
    p["lin2_w"] = s * jax.random.normal(ks[15], (hidden, out_ch), jnp.float32)
    p["lin2_b"] = jnp.zeros((out_ch,), jnp.float32)
    return p


if __name__ == "__main__":
    N = 16          # nodes
    IN_CH = 8
    HIDDEN = 16
    OUT_CH = 4
    HEADS = 2
    NUM_GRAPHS = 2

    key = jax.random.PRNGKey(0)
    k_param, k_x, k_attn = jax.random.split(key, 3)

    params = init_params(k_param, IN_CH, HIDDEN, OUT_CH, HEADS)
    x = jax.random.normal(k_x, (N, IN_CH), jnp.float32)
    attn_tensor = jax.random.normal(k_attn, (12, N, N), jnp.float32)
    batch_idx = jnp.concatenate([jnp.zeros(N // 2, jnp.int32),
                                 jnp.ones(N // 2, jnp.int32)])

    out, edge_attr_dense = gat_weight_forward(params, x, attn_tensor,
                                              batch_idx, NUM_GRAPHS,
                                              threshold=0.0)
    jax.block_until_ready(out)
    jax.block_until_ready(edge_attr_dense)
    assert out.shape == (NUM_GRAPHS, OUT_CH)
    assert edge_attr_dense.shape == (N, N)
    assert bool(jnp.all(jnp.isfinite(out)))
    print("KERNEL_OK")
</pallas_src>

<mosaic_0001>
module attributes {stable_mosaic.version = 11 : i64} {
  func.func @_fused_kernel(%arg0: memref<12x16x16xf32, #tpu.memory_space<vmem>>, %arg1: memref<12xf32, #tpu.memory_space<smem>>, %arg2: memref<1xf32, #tpu.memory_space<smem>>, %arg3: memref<16x8xf32, #tpu.memory_space<vmem>>, %arg4: memref<8x32xf32, #tpu.memory_space<vmem>>, %arg5: memref<32x2xf32, #tpu.memory_space<vmem>>, %arg6: memref<2x32xf32, #tpu.memory_space<vmem>>, %arg7: memref<2xf32, #tpu.memory_space<smem>>, %arg8: memref<1x32xf32, #tpu.memory_space<vmem>>, %arg9: memref<32x16xf32, #tpu.memory_space<vmem>>, %arg10: memref<16x1xf32, #tpu.memory_space<vmem>>, %arg11: memref<1x16xf32, #tpu.memory_space<vmem>>, %arg12: memref<1xf32, #tpu.memory_space<smem>>, %arg13: memref<1x16xf32, #tpu.memory_space<vmem>>, %arg14: memref<2x16xf32, #tpu.memory_space<vmem>>, %arg15: memref<16x16xf32, #tpu.memory_space<vmem>>, %arg16: memref<1x16xf32, #tpu.memory_space<vmem>>, %arg17: memref<1x16xf32, #tpu.memory_space<vmem>>, %arg18: memref<1x16xf32, #tpu.memory_space<vmem>>, %arg19: memref<16x4xf32, #tpu.memory_space<vmem>>, %arg20: memref<1x4xf32, #tpu.memory_space<vmem>>, %arg21: memref<2x4xf32, #tpu.memory_space<vmem>>, %arg22: memref<16x16xf32, #tpu.memory_space<vmem>>) attributes {dimension_semantics = [], scalar_prefetch = 0 : i64, scratch_operands = 0 : i64, tpu.core_type = #tpu.core_type<tc>} {
    %cst = arith.constant 0.000000e+00 : f32
    %0 = vector.broadcast %cst : f32 to vector<16x16xf32>
    %c0 = arith.constant 0 : index
    %c0_0 = arith.constant 0 : index
    %c0_1 = arith.constant 0 : index
    %1 = vector.load %arg0[%c0, %c0_0, %c0_1] : memref<12x16x16xf32, #tpu.memory_space<vmem>>, vector<1x16x16xf32>
    %2 = vector.shape_cast %1 : vector<1x16x16xf32> to vector<16x16xf32>
    %c0_2 = arith.constant 0 : index
    %3 = memref.load %arg1[%c0_2] : memref<12xf32, #tpu.memory_space<smem>>
    %4 = vector.broadcast %3 : f32 to vector<16x16xf32>
    %5 = arith.mulf %2, %4 : vector<16x16xf32>
    %6 = arith.addf %0, %5 : vector<16x16xf32>
    %c1 = arith.constant 1 : index
    %c0_3 = arith.constant 0 : index
    %c0_4 = arith.constant 0 : index
    %7 = vector.load %arg0[%c1, %c0_3, %c0_4] : memref<12x16x16xf32, #tpu.memory_space<vmem>>, vector<1x16x16xf32>
    %8 = vector.shape_cast %7 : vector<1x16x16xf32> to vector<16x16xf32>
    %c1_5 = arith.constant 1 : index
    %9 = memref.load %arg1[%c1_5] : memref<12xf32, #tpu.memory_space<smem>>
    %10 = vector.broadcast %9 : f32 to vector<16x16xf32>
    %11 = arith.mulf %8, %10 : vector<16x16xf32>
    %12 = arith.addf %6, %11 : vector<16x16xf32>
    %c2 = arith.constant 2 : index
    %c0_6 = arith.constant 0 : index
    %c0_7 = arith.constant 0 : index
    %13 = vector.load %arg0[%c2, %c0_6, %c0_7] : memref<12x16x16xf32, #tpu.memory_space<vmem>>, vector<1x16x16xf32>
    %14 = vector.shape_cast %13 : vector<1x16x16xf32> to vector<16x16xf32>
    %c2_8 = arith.constant 2 : index
    %15 = memref.load %arg1[%c2_8] : memref<12xf32, #tpu.memory_space<smem>>
    %16 = vector.broadcast %15 : f32 to vector<16x16xf32>
    %17 = arith.mulf %14, %16 : vector<16x16xf32>
    %18 = arith.addf %12, %17 : vector<16x16xf32>
    %c3 = arith.constant 3 : index
    %c0_9 = arith.constant 0 : index
    %c0_10 = arith.constant 0 : index
    %19 = vector.load %arg0[%c3, %c0_9, %c0_10] : memref<12x16x16xf32, #tpu.memory_space<vmem>>, vector<1x16x16xf32>
    %20 = vector.shape_cast %19 : vector<1x16x16xf32> to vector<16x16xf32>
    %c3_11 = arith.constant 3 : index
    %21 = memref.load %arg1[%c3_11] : memref<12xf32, #tpu.memory_space<smem>>
    %22 = vector.broadcast %21 : f32 to vector<16x16xf32>
    %23 = arith.mulf %20, %22 : vector<16x16xf32>
    %24 = arith.addf %18, %23 : vector<16x16xf32>
    %c4 = arith.constant 4 : index
    %c0_12 = arith.constant 0 : index
    %c0_13 = arith.constant 0 : index
    %25 = vector.load %arg0[%c4, %c0_12, %c0_13] : memref<12x16x16xf32, #tpu.memory_space<vmem>>, vector<1x16x16xf32>
    %26 = vector.shape_cast %25 : vector<1x16x16xf32> to vector<16x16xf32>
    %c4_14 = arith.constant 4 : index
    %27 = memref.load %arg1[%c4_14] : memref<12xf32, #tpu.memory_space<smem>>
    %28 = vector.broadcast %27 : f32 to vector<16x16xf32>
    %29 = arith.mulf %26, %28 : vector<16x16xf32>
    %30 = arith.addf %24, %29 : vector<16x16xf32>
    %c5 = arith.constant 5 : index
    %c0_15 = arith.constant 0 : index
    %c0_16 = arith.constant 0 : index
    %31 = vector.load %arg0[%c5, %c0_15, %c0_16] : memref<12x16x16xf32, #tpu.memory_space<vmem>>, vector<1x16x16xf32>
    %32 = vector.shape_cast %31 : vector<1x16x16xf32> to vector<16x16xf32>
    %c5_17 = arith.constant 5 : index
    %33 = memref.load %arg1[%c5_17] : memref<12xf32, #tpu.memory_space<smem>>
    %34 = vector.broadcast %33 : f32 to vector<16x16xf32>
    %35 = arith.mulf %32, %34 : vector<16x16xf32>
    %36 = arith.addf %30, %35 : vector<16x16xf32>
    %c6 = arith.constant 6 : index
    %c0_18 = arith.constant 0 : index
    %c0_19 = arith.constant 0 : index
    %37 = vector.load %arg0[%c6, %c0_18, %c0_19] : memref<12x16x16xf32, #tpu.memory_space<vmem>>, vector<1x16x16xf32>
    %38 = vector.shape_cast %37 : vector<1x16x16xf32> to vector<16x16xf32>
    %c6_20 = arith.constant 6 : index
    %39 = memref.load %arg1[%c6_20] : memref<12xf32, #tpu.memory_space<smem>>
    %40 = vector.broadcast %39 : f32 to vector<16x16xf32>
    %41 = arith.mulf %38, %40 : vector<16x16xf32>
    %42 = arith.addf %36, %41 : vector<16x16xf32>
    %c7 = arith.constant 7 : index
    %c0_21 = arith.constant 0 : index
    %c0_22 = arith.constant 0 : index
    %43 = vector.load %arg0[%c7, %c0_21, %c0_22] : memref<12x16x16xf32, #tpu.memory_space<vmem>>, vector<1x16x16xf32>
    %44 = vector.shape_cast %43 : vector<1x16x16xf32> to vector<16x16xf32>
    %c7_23 = arith.constant 7 : index
    %45 = memref.load %arg1[%c7_23] : memref<12xf32, #tpu.memory_space<smem>>
    %46 = vector.broadcast %45 : f32 to vector<16x16xf32>
    %47 = arith.mulf %44, %46 : vector<16x16xf32>
    %48 = arith.addf %42, %47 : vector<16x16xf32>
    %c8 = arith.constant 8 : index
    %c0_24 = arith.constant 0 : index
    %c0_25 = arith.constant 0 : index
    %49 = vector.load %arg0[%c8, %c0_24, %c0_25] : memref<12x16x16xf32, #tpu.memory_space<vmem>>, vector<1x16x16xf32>
    %50 = vector.shape_cast %49 : vector<1x16x16xf32> to vector<16x16xf32>
    %c8_26 = arith.constant 8 : index
    %51 = memref.load %arg1[%c8_26] : memref<12xf32, #tpu.memory_space<smem>>
    %52 = vector.broadcast %51 : f32 to vector<16x16xf32>
    %53 = arith.mulf %50, %52 : vector<16x16xf32>
    %54 = arith.addf %48, %53 : vector<16x16xf32>
    %c9 = arith.constant 9 : index
    %c0_27 = arith.constant 0 : index
    %c0_28 = arith.constant 0 : index
    %55 = vector.load %arg0[%c9, %c0_27, %c0_28] : memref<12x16x16xf32, #tpu.memory_space<vmem>>, vector<1x16x16xf32>
    %56 = vector.shape_cast %55 : vector<1x16x16xf32> to vector<16x16xf32>
    %c9_29 = arith.constant 9 : index
    %57 = memref.load %arg1[%c9_29] : memref<12xf32, #tpu.memory_space<smem>>
    %58 = vector.broadcast %57 : f32 to vector<16x16xf32>
    %59 = arith.mulf %56, %58 : vector<16x16xf32>
    %60 = arith.addf %54, %59 : vector<16x16xf32>
    %c10 = arith.constant 10 : index
    %c0_30 = arith.constant 0 : index
    %c0_31 = arith.constant 0 : index
    %61 = vector.load %arg0[%c10, %c0_30, %c0_31] : memref<12x16x16xf32, #tpu.memory_space<vmem>>, vector<1x16x16xf32>
    %62 = vector.shape_cast %61 : vector<1x16x16xf32> to vector<16x16xf32>
    %c10_32 = arith.constant 10 : index
    %63 = memref.load %arg1[%c10_32] : memref<12xf32, #tpu.memory_space<smem>>
    %64 = vector.broadcast %63 : f32 to vector<16x16xf32>
    %65 = arith.mulf %62, %64 : vector<16x16xf32>
    %66 = arith.addf %60, %65 : vector<16x16xf32>
    %c11 = arith.constant 11 : index
    %c0_33 = arith.constant 0 : index
    %c0_34 = arith.constant 0 : index
    %67 = vector.load %arg0[%c11, %c0_33, %c0_34] : memref<12x16x16xf32, #tpu.memory_space<vmem>>, vector<1x16x16xf32>
    %68 = vector.shape_cast %67 : vector<1x16x16xf32> to vector<16x16xf32>
    %c11_35 = arith.constant 11 : index
    %69 = memref.load %arg1[%c11_35] : memref<12xf32, #tpu.memory_space<smem>>
    %70 = vector.broadcast %69 : f32 to vector<16x16xf32>
    %71 = arith.mulf %68, %70 : vector<16x16xf32>
    %72 = arith.addf %66, %71 : vector<16x16xf32>
    %c0_36 = arith.constant 0 : index
    %73 = memref.load %arg2[%c0_36] : memref<1xf32, #tpu.memory_space<smem>>
    %74 = vector.broadcast %73 : f32 to vector<16x16xf32>
    %75 = arith.addf %72, %74 : vector<16x16xf32>
    %76 = tpu.iota {dimensions = array<i32: 0>} : vector<16x16xi32>
    %77 = tpu.iota {dimensions = array<i32: 1>} : vector<16x16xi32>
    %78 = arith.cmpi eq, %76, %77 : vector<16x16xi32>
    %79 = arith.extui %78 : vector<16x16xi1> to vector<16x16xi32>
    %80 = arith.sitofp %79 : vector<16x16xi32> to vector<16x16xf32>
    %cst_37 = arith.constant 0.000000e+00 : f32
    %81 = vector.broadcast %cst_37 : f32 to vector<16x16xf32>
    %82 = arith.cmpf ogt, %75, %81 : vector<16x16xf32>
    %83 = arith.extui %82 : vector<16x16xi1> to vector<16x16xi32>
    %84 = arith.sitofp %83 : vector<16x16xi32> to vector<16x16xf32>
    %85 = arith.mulf %75, %84 : vector<16x16xf32>
    %c0_38 = arith.constant 0 : index
    %c0_39 = arith.constant 0 : index
    %86 = vector.load %arg22[%c0_38, %c0_39] : memref<16x16xf32, #tpu.memory_space<vmem>>, vector<16x16xf32>
    tpu.vector_store %arg22[%c0_38, %c0_39], %85 {strides = array<i32>} : memref<16x16xf32, #tpu.memory_space<vmem>>, vector<16x16xf32>,
    %cst_40 = arith.constant 1.000000e+00 : f32
    %87 = vector.broadcast %cst_40 : f32 to vector<16x16xf32>
    %88 = arith.subf %87, %80 : vector<16x16xf32>
    %89 = arith.mulf %84, %88 : vector<16x16xf32>
    %90 = arith.mulf %75, %89 : vector<16x16xf32>
    %cst_41 = arith.constant dense<0.000000e+00> : vector<16xf32>
    %91 = vector.multi_reduction <add>, %89, %cst_41 [1] : vector<16x16xf32> to vector<16xf32>
    %92 = vector.shape_cast %91 : vector<16xf32> to vector<16x1xf32>
    %cst_42 = arith.constant dense<0.000000e+00> : vector<16xf32>
    %93 = vector.multi_reduction <add>, %90, %cst_42 [1] : vector<16x16xf32> to vector<16xf32>
    %94 = vector.shape_cast %93 : vector<16xf32> to vector<16x1xf32>
    %cst_43 = arith.constant 1.000000e+00 : f32
    %95 = vector.broadcast %cst_43 : f32 to vector<16x1xf32>
    %96 = arith.maximumf %92, %95 : vector<16x1xf32>
    %97 = tpu.reciprocal %96 {approx = true} : vector<16x1xf32> -> vector<16x1xf32>
    %98 = arith.mulf %94, %97 : vector<16x1xf32>
    %99 = arith.addf %89, %80 : vector<16x16xf32>
    %100 = vector.broadcast %98 : vector<16x1xf32> to vector<16x16xf32>
    %101 = arith.mulf %80, %100 : vector<16x16xf32>
    %102 = arith.addf %90, %101 : vector<16x16xf32>
    %c0_44 = arith.constant 0 : index
    %c0_45 = arith.constant 0 : index
    %103 = vector.load %arg3[%c0_44, %c0_45] : memref<16x8xf32, #tpu.memory_space<vmem>>, vector<16x8xf32>
    %c0_46 = arith.constant 0 : index
    %c0_47 = arith.constant 0 : index
    %104 = vector.load %arg4[%c0_46, %c0_47] : memref<8x32xf32, #tpu.memory_space<vmem>>, vector<8x32xf32>
    %cst_48 = arith.constant dense<0.000000e+00> : vector<16x32xf32>
    %105 = tpu.matmul %103, %104, %cst_48 {dimension_numbers = #tpu.dot_dimension_numbers<[1], [0], [0], [1], [0, 0, 1, 1], [], []>} : vector<16x8xf32>, vector<8x32xf32>, vector<16x32xf32> -> vector<16x32xf32>
    %c0_49 = arith.constant 0 : index
    %c0_50 = arith.constant 0 : index
    %106 = vector.load %arg5[%c0_49, %c0_50] : memref<32x2xf32, #tpu.memory_space<vmem>>, vector<32x2xf32>
    %cst_51 = arith.constant dense<0.000000e+00> : vector<16x2xf32>
    %107 = tpu.matmul %105, %106, %cst_51 {dimension_numbers = #tpu.dot_dimension_numbers<[1], [0], [0], [1], [0, 0, 1, 1], [], []>} : vector<16x32xf32>, vector<32x2xf32>, vector<16x2xf32> -> vector<16x2xf32>
    %c0_52 = arith.constant 0 : index
    %c0_53 = arith.constant 0 : index
    %108 = vector.load %arg6[%c0_52, %c0_53] : memref<2x32xf32, #tpu.memory_space<vmem>>, vector<2x32xf32>
    %cst_54 = arith.constant dense<0.000000e+00> : vector<2x16xf32>
    %109 = tpu.matmul %108, %105, %cst_54 {dimension_numbers = #tpu.dot_dimension_numbers<[1], [1], [0], [0], [0, 0, 1, 0], [], []>} : vector<2x32xf32>, vector<16x32xf32>, vector<2x16xf32> -> vector<2x16xf32>
    %110 = vector.extract_strided_slice %107 {offsets = [0, 0], sizes = [16, 1], strides = [1, 1]} : vector<16x2xf32> to vector<16x1xf32>
    %111 = vector.extract_strided_slice %109 {offsets = [0, 0], sizes = [1, 16], strides = [1, 1]} : vector<2x16xf32> to vector<1x16xf32>
    %112 = vector.broadcast %110 : vector<16x1xf32> to vector<16x16xf32>
    %113 = vector.broadcast %111 : vector<1x16xf32> to vector<16x16xf32>
    %114 = arith.addf %112, %113 : vector<16x16xf32>
    %c0_55 = arith.constant 0 : index
    %115 = memref.load %arg7[%c0_55] : memref<2xf32, #tpu.memory_space<smem>>
    %116 = vector.broadcast %115 : f32 to vector<16x16xf32>
    %117 = arith.mulf %102, %116 : vector<16x16xf32>
    %118 = arith.addf %114, %117 : vector<16x16xf32>
    %cst_56 = arith.constant 0.000000e+00 : f32
    %119 = vector.broadcast %cst_56 : f32 to vector<16x16xf32>
    %120 = arith.cmpf ogt, %118, %119 : vector<16x16xf32>
    %cst_57 = arith.constant 2.000000e-01 : f32
    %121 = vector.broadcast %cst_57 : f32 to vector<16x16xf32>
    %122 = arith.mulf %121, %118 : vector<16x16xf32>
    %123 = arith.select %120, %118, %122 : vector<16x16xi1>, vector<16x16xf32>
    %cst_58 = arith.constant 0.000000e+00 : f32
    %124 = vector.broadcast %cst_58 : f32 to vector<16x16xf32>
    %125 = arith.cmpf ogt, %99, %124 : vector<16x16xf32>
    %cst_59 = arith.constant -1.000000e+30 : f32
    %126 = vector.broadcast %cst_59 : f32 to vector<16x16xf32>
    %127 = arith.select %125, %123, %126 : vector<16x16xi1>, vector<16x16xf32>
    %cst_60 = arith.constant dense<0xFF800000> : vector<16xf32>
    %128 = vector.multi_reduction <maximumf>, %127, %cst_60 [1] : vector<16x16xf32> to vector<16xf32>
    %129 = vector.shape_cast %128 : vector<16xf32> to vector<16x1xf32>
    %130 = vector.broadcast %129 : vector<16x1xf32> to vector<16x16xf32>
    %131 = arith.subf %127, %130 : vector<16x16xf32>
    %132 = math.exp %131 : vector<16x16xf32>
    %133 = arith.mulf %132, %99 : vector<16x16xf32>
    %cst_61 = arith.constant dense<0.000000e+00> : vector<16xf32>
    %134 = vector.multi_reduction <add>, %133, %cst_61 [1] : vector<16x16xf32> to vector<16xf32>
    %135 = vector.shape_cast %134 : vector<16xf32> to vector<16x1xf32>
    %136 = tpu.reciprocal %135 {approx = true} : vector<16x1xf32> -> vector<16x1xf32>
    %137 = vector.broadcast %136 : vector<16x1xf32> to vector<16x16xf32>
    %138 = arith.mulf %133, %137 : vector<16x16xf32>
    %139 = vector.extract_strided_slice %105 {offsets = [0, 0], sizes = [16, 16], strides = [1, 1]} : vector<16x32xf32> to vector<16x16xf32>
    %cst_62 = arith.constant dense<0.000000e+00> : vector<16x16xf32>
    %140 = tpu.matmul %138, %139, %cst_62 {dimension_numbers = #tpu.dot_dimension_numbers<[1], [0], [0], [1], [0, 0, 1, 1], [], []>} : vector<16x16xf32>, vector<16x16xf32>, vector<16x16xf32> -> vector<16x16xf32>
    %141 = vector.extract_strided_slice %107 {offsets = [0, 1], sizes = [16, 1], strides = [1, 1]} : vector<16x2xf32> to vector<16x1xf32>
    %142 = vector.extract_strided_slice %109 {offsets = [1, 0], sizes = [1, 16], strides = [1, 1]} : vector<2x16xf32> to vector<1x16xf32>
    %143 = vector.broadcast %141 : vector<16x1xf32> to vector<16x16xf32>
    %144 = vector.broadcast %142 : vector<1x16xf32> to vector<16x16xf32>
    %145 = arith.addf %143, %144 : vector<16x16xf32>
    %c1_63 = arith.constant 1 : index
    %146 = memref.load %arg7[%c1_63] : memref<2xf32, #tpu.memory_space<smem>>
    %147 = vector.broadcast %146 : f32 to vector<16x16xf32>
    %148 = arith.mulf %102, %147 : vector<16x16xf32>
    %149 = arith.addf %145, %148 : vector<16x16xf32>
    %cst_64 = arith.constant 0.000000e+00 : f32
    %150 = vector.broadcast %cst_64 : f32 to vector<16x16xf32>
    %151 = arith.cmpf ogt, %149, %150 : vector<16x16xf32>
    %cst_65 = arith.constant 2.000000e-01 : f32
    %152 = vector.broadcast %cst_65 : f32 to vector<16x16xf32>
    %153 = arith.mulf %152, %149 : vector<16x16xf32>
    %154 = arith.select %151, %149, %153 : vector<16x16xi1>, vector<16x16xf32>
    %cst_66 = arith.constant 0.000000e+00 : f32
    %155 = vector.broadcast %cst_66 : f32 to vector<16x16xf32>
    %156 = arith.cmpf ogt, %99, %155 : vector<16x16xf32>
    %cst_67 = arith.constant -1.000000e+30 : f32
    %157 = vector.broadcast %cst_67 : f32 to vector<16x16xf32>
    %158 = arith.select %156, %154, %157 : vector<16x16xi1>, vector<16x16xf32>
    %cst_68 = arith.constant dense<0xFF800000> : vector<16xf32>
    %159 = vector.multi_reduction <maximumf>, %158, %cst_68 [1] : vector<16x16xf32> to vector<16xf32>
    %160 = vector.shape_cast %159 : vector<16xf32> to vector<16x1xf32>
    %161 = vector.broadcast %160 : vector<16x1xf32> to vector<16x16xf32>
    %162 = arith.subf %158, %161 : vector<16x16xf32>
    %163 = math.exp %162 : vector<16x16xf32>
    %164 = arith.mulf %163, %99 : vector<16x16xf32>
    %cst_69 = arith.constant dense<0.000000e+00> : vector<16xf32>
    %165 = vector.multi_reduction <add>, %164, %cst_69 [1] : vector<16x16xf32> to vector<16xf32>
    %166 = vector.shape_cast %165 : vector<16xf32> to vector<16x1xf32>
    %167 = tpu.reciprocal %166 {approx = true} : vector<16x1xf32> -> vector<16x1xf32>
    %168 = vector.broadcast %167 : vector<16x1xf32> to vector<16x16xf32>
    %169 = arith.mulf %164, %168 : vector<16x16xf32>
    %170 = vector.extract_strided_slice %105 {offsets = [0, 16], sizes = [16, 16], strides = [1, 1]} : vector<16x32xf32> to vector<16x16xf32>
    %cst_70 = arith.constant dense<0.000000e+00> : vector<16x16xf32>
    %171 = tpu.matmul %169, %170, %cst_70 {dimension_numbers = #tpu.dot_dimension_numbers<[1], [0], [0], [1], [0, 0, 1, 1], [], []>} : vector<16x16xf32>, vector<16x16xf32>, vector<16x16xf32> -> vector<16x16xf32>
    %172 = tpu.concatenate %140, %171 in 1 : vector<16x16xf32>, vector<16x16xf32> -> vector<16x32xf32>
    %c0_71 = arith.constant 0 : index
    %c0_72 = arith.constant 0 : index
    %173 = vector.load %arg8[%c0_71, %c0_72] : memref<1x32xf32, #tpu.memory_space<vmem>>, vector<1x32xf32>
    %174 = vector.broadcast %173 : vector<1x32xf32> to vector<16x32xf32>
    %175 = arith.addf %172, %174 : vector<16x32xf32>
    %cst_73 = arith.constant 0.000000e+00 : f32
    %176 = vector.broadcast %cst_73 : f32 to vector<16x32xf32>
    %177 = arith.maximumf %175, %176 : vector<16x32xf32>
    %c0_74 = arith.constant 0 : index
    %c0_75 = arith.constant 0 : index
    %178 = vector.load %arg9[%c0_74, %c0_75] : memref<32x16xf32, #tpu.memory_space<vmem>>, vector<32x16xf32>
    %cst_76 = arith.constant dense<0.000000e+00> : vector<16x16xf32>
    %179 = tpu.matmul %177, %178, %cst_76 {dimension_numbers = #tpu.dot_dimension_numbers<[1], [0], [0], [1], [0, 0, 1, 1], [], []>} : vector<16x32xf32>, vector<32x16xf32>, vector<16x16xf32> -> vector<16x16xf32>
    %c0_77 = arith.constant 0 : index
    %c0_78 = arith.constant 0 : index
    %180 = vector.load %arg10[%c0_77, %c0_78] : memref<16x1xf32, #tpu.memory_space<vmem>>, vector<16x1xf32>
    %cst_79 = arith.constant dense<0.000000e+00> : vector<16x1xf32>
    %181 = tpu.matmul %179, %180, %cst_79 {dimension_numbers = #tpu.dot_dimension_numbers<[1], [0], [0], [1], [0, 0, 1, 1], [], []>} : vector<16x16xf32>, vector<16x1xf32>, vector<16x1xf32> -> vector<16x1xf32>
    %c0_80 = arith.constant 0 : index
    %c0_81 = arith.constant 0 : index
    %182 = vector.load %arg11[%c0_80, %c0_81] : memref<1x16xf32, #tpu.memory_space<vmem>>, vector<1x16xf32>
    %cst_82 = arith.constant dense<0.000000e+00> : vector<1x16xf32>
    %183 = tpu.matmul %182, %179, %cst_82 {dimension_numbers = #tpu.dot_dimension_numbers<[1], [1], [0], [0], [0, 0, 1, 0], [], []>} : vector<1x16xf32>, vector<16x16xf32>, vector<1x16xf32> -> vector<1x16xf32>
    %184 = vector.broadcast %181 : vector<16x1xf32> to vector<16x16xf32>
    %185 = vector.broadcast %183 : vector<1x16xf32> to vector<16x16xf32>
    %186 = arith.addf %184, %185 : vector<16x16xf32>
    %c0_83 = arith.constant 0 : index
    %187 = memref.load %arg12[%c0_83] : memref<1xf32, #tpu.memory_space<smem>>
    %188 = vector.broadcast %187 : f32 to vector<16x16xf32>
    %189 = arith.mulf %102, %188 : vector<16x16xf32>
    %190 = arith.addf %186, %189 : vector<16x16xf32>
    %cst_84 = arith.constant 0.000000e+00 : f32
    %191 = vector.broadcast %cst_84 : f32 to vector<16x16xf32>
    %192 = arith.cmpf ogt, %190, %191 : vector<16x16xf32>
    %cst_85 = arith.constant 2.000000e-01 : f32
    %193 = vector.broadcast %cst_85 : f32 to vector<16x16xf32>
    %194 = arith.mulf %193, %190 : vector<16x16xf32>
    %195 = arith.select %192, %190, %194 : vector<16x16xi1>, vector<16x16xf32>
    %cst_86 = arith.constant 0.000000e+00 : f32
    %196 = vector.broadcast %cst_86 : f32 to vector<16x16xf32>
    %197 = arith.cmpf ogt, %99, %196 : vector<16x16xf32>
    %cst_87 = arith.constant -1.000000e+30 : f32
    %198 = vector.broadcast %cst_87 : f32 to vector<16x16xf32>
    %199 = arith.select %197, %195, %198 : vector<16x16xi1>, vector<16x16xf32>
    %cst_88 = arith.constant dense<0xFF800000> : vector<16xf32>
    %200 = vector.multi_reduction <maximumf>, %199, %cst_88 [1] : vector<16x16xf32> to vector<16xf32>
    %201 = vector.shape_cast %200 : vector<16xf32> to vector<16x1xf32>
    %202 = vector.broadcast %201 : vector<16x1xf32> to vector<16x16xf32>
    %203 = arith.subf %199, %202 : vector<16x16xf32>
    %204 = math.exp %203 : vector<16x16xf32>
    %205 = arith.mulf %204, %99 : vector<16x16xf32>
    %cst_89 = arith.constant dense<0.000000e+00> : vector<16xf32>
    %206 = vector.multi_reduction <add>, %205, %cst_89 [1] : vector<16x16xf32> to vector<16xf32>
    %207 = vector.shape_cast %206 : vector<16xf32> to vector<16x1xf32>
    %208 = tpu.reciprocal %207 {approx = true} : vector<16x1xf32> -> vector<16x1xf32>
    %209 = vector.broadcast %208 : vector<16x1xf32> to vector<16x16xf32>
    %210 = arith.mulf %205, %209 : vector<16x16xf32>
    %cst_90 = arith.constant dense<0.000000e+00> : vector<16x16xf32>
    %211 = tpu.matmul %210, %179, %cst_90 {dimension_numbers = #tpu.dot_dimension_numbers<[1], [0], [0], [1], [0, 0, 1, 1], [], []>} : vector<16x16xf32>, vector<16x16xf32>, vector<16x16xf32> -> vector<16x16xf32>
    %c0_91 = arith.constant 0 : index
    %c0_92 = arith.constant 0 : index
    %212 = vector.load %arg13[%c0_91, %c0_92] : memref<1x16xf32, #tpu.memory_space<vmem>>, vector<1x16xf32>
    %213 = vector.broadcast %212 : vector<1x16xf32> to vector<16x16xf32>
    %214 = arith.addf %211, %213 : vector<16x16xf32>
    %c0_93 = arith.constant 0 : index
    %c0_94 = arith.constant 0 : index
    %215 = vector.load %arg14[%c0_93, %c0_94] : memref<2x16xf32, #tpu.memory_space<vmem>>, vector<2x16xf32>
    %cst_95 = arith.constant dense<0.000000e+00> : vector<2x16xf32>
    %216 = tpu.matmul %215, %214, %cst_95 {dimension_numbers = #tpu.dot_dimension_numbers<[1], [0], [0], [1], [0, 0, 1, 1], [], []>} : vector<2x16xf32>, vector<16x16xf32>, vector<2x16xf32> -> vector<2x16xf32>
    %c0_96 = arith.constant 0 : index
    %c0_97 = arith.constant 0 : index
    %217 = vector.load %arg15[%c0_96, %c0_97] : memref<16x16xf32, #tpu.memory_space<vmem>>, vector<16x16xf32>
    %cst_98 = arith.constant dense<0.000000e+00> : vector<2x16xf32>
    %218 = tpu.matmul %216, %217, %cst_98 {dimension_numbers = #tpu.dot_dimension_numbers<[1], [0], [0], [1], [0, 0, 1, 1], [], []>} : vector<2x16xf32>, vector<16x16xf32>, vector<2x16xf32> -> vector<2x16xf32>
    %c0_99 = arith.constant 0 : index
    %c0_100 = arith.constant 0 : index
    %219 = vector.load %arg16[%c0_99, %c0_100] : memref<1x16xf32, #tpu.memory_space<vmem>>, vector<1x16xf32>
    %220 = vector.broadcast %219 : vector<1x16xf32> to vector<2x16xf32>
    %221 = arith.addf %218, %220 : vector<2x16xf32>
    %cst_101 = arith.constant 0.000000e+00 : f32
    %222 = vector.broadcast %cst_101 : f32 to vector<2x16xf32>
    %223 = arith.maximumf %221, %222 : vector<2x16xf32>
    %cst_102 = arith.constant dense<0.000000e+00> : vector<2xf32>
    %224 = vector.multi_reduction <add>, %223, %cst_102 [1] : vector<2x16xf32> to vector<2xf32>
    %225 = vector.shape_cast %224 : vector<2xf32> to vector<2x1xf32>
    %cst_103 = arith.constant 1.600000e+01 : f32
    %226 = vector.broadcast %cst_103 : f32 to vector<2x1xf32>
    %227 = arith.divf %225, %226 : vector<2x1xf32>
    %228 = vector.broadcast %227 : vector<2x1xf32> to vector<2x16xf32>
    %229 = arith.subf %223, %228 : vector<2x16xf32>
    %230 = arith.mulf %229, %229 : vector<2x16xf32>
    %cst_104 = arith.constant dense<0.000000e+00> : vector<2xf32>
    %231 = vector.multi_reduction <add>, %230, %cst_104 [1] : vector<2x16xf32> to vector<2xf32>
    %232 = vector.shape_cast %231 : vector<2xf32> to vector<2x1xf32>
    %cst_105 = arith.constant 1.600000e+01 : f32
    %233 = vector.broadcast %cst_105 : f32 to vector<2x1xf32>
    %234 = arith.divf %232, %233 : vector<2x1xf32>
    %235 = vector.broadcast %227 : vector<2x1xf32> to vector<2x16xf32>
    %236 = arith.subf %223, %235 : vector<2x16xf32>
    %cst_106 = arith.constant 9.99999974E-6 : f32
    %237 = vector.broadcast %cst_106 : f32 to vector<2x1xf32>
    %238 = arith.addf %234, %237 : vector<2x1xf32>
    %239 = math.rsqrt %238 : vector<2x1xf32>
    %240 = vector.broadcast %239 : vector<2x1xf32> to vector<2x16xf32>
    %241 = arith.mulf %236, %240 : vector<2x16xf32>
    %c0_107 = arith.constant 0 : index
    %c0_108 = arith.constant 0 : index
    %242 = vector.load %arg17[%c0_107, %c0_108] : memref<1x16xf32, #tpu.memory_space<vmem>>, vector<1x16xf32>
    %243 = vector.broadcast %242 : vector<1x16xf32> to vector<2x16xf32>
    %244 = arith.mulf %241, %243 : vector<2x16xf32>
    %c0_109 = arith.constant 0 : index
    %c0_110 = arith.constant 0 : index
    %245 = vector.load %arg18[%c0_109, %c0_110] : memref<1x16xf32, #tpu.memory_space<vmem>>, vector<1x16xf32>
    %246 = vector.broadcast %245 : vector<1x16xf32> to vector<2x16xf32>
    %247 = arith.addf %244, %246 : vector<2x16xf32>
    %c0_111 = arith.constant 0 : index
    %c0_112 = arith.constant 0 : index
    %248 = vector.load %arg19[%c0_111, %c0_112] : memref<16x4xf32, #tpu.memory_space<vmem>>, vector<16x4xf32>
    %cst_113 = arith.constant dense<0.000000e+00> : vector<2x4xf32>
    %249 = tpu.matmul %247, %248, %cst_113 {dimension_numbers = #tpu.dot_dimension_numbers<[1], [0], [0], [1], [0, 0, 1, 1], [], []>} : vector<2x16xf32>, vector<16x4xf32>, vector<2x4xf32> -> vector<2x4xf32>
    %c0_114 = arith.constant 0 : index
    %c0_115 = arith.constant 0 : index
    %250 = vector.load %arg20[%c0_114, %c0_115] : memref<1x4xf32, #tpu.memory_space<vmem>>, vector<1x4xf32>
    %251 = vector.broadcast %250 : vector<1x4xf32> to vector<2x4xf32>
    %252 = arith.addf %249, %251 : vector<2x4xf32>
    %c0_116 = arith.constant 0 : index
    %c0_117 = arith.constant 0 : index
    %253 = vector.load %arg21[%c0_116, %c0_117] : memref<2x4xf32, #tpu.memory_space<vmem>>, vector<2x4xf32>
    tpu.vector_store %arg21[%c0_116, %c0_117], %252 {strides = array<i32>} : memref<2x4xf32, #tpu.memory_space<vmem>>, vector<2x4xf32>,
    return
  }
}

</mosaic_0001>

<bundles_post_ra>
// kernel: tpu_custom_call.1
= control target key start
LH: loop header
LB: loop body
LE: loop exit
PB: predicated region body
PF: predicated region fallthrough
CT: control target
= control target key end

     0   :  { %s2340_s0 = inlined_call_operand.hbm [shape: f32[12,16,16], index: 0, kind: input, shape index: {}]   ;;  %s2341_s1 = inlined_call_operand.vmem [shape: f32[12], index: 1, kind: input, shape index: {}]   ;;  %s2342_s2 = inlined_call_operand.<no memory space> [shape: f32[1], index: 2, kind: input, shape index: {}]   ;;  %s2343_s3 = inlined_call_operand.vmem [shape: f32[16,8], index: 3, kind: input, shape index: {}]   ;;  %s2344_s4 = inlined_call_operand.vmem [shape: f32[8,32], index: 4, kind: input, shape index: {}]   ;;  %s2345_s5 = inlined_call_operand.vmem [shape: f32[32,2], index: 5, kind: input, shape index: {}]   ;;  %s2346_s6 = inlined_call_operand.vmem [shape: f32[2,32], index: 6, kind: input, shape index: {}]   ;;  %s2347_s7 = inlined_call_operand.vmem [shape: f32[2], index: 7, kind: input, shape index: {}]   ;;  %s2348_s8 = inlined_call_operand.vmem [shape: f32[1,32], index: 8, kind: input, shape index: {}]   ;;  %s2349_s9 = inlined_call_operand.vmem [shape: f32[32,16], index: 9, kind: input, shape index: {}]   ;;  %s2350_s10 = inlined_call_operand.vmem [shape: f32[16,1], index: 10, kind: input, shape index: {}]   ;;  %s2351_s11 = inlined_call_operand.vmem [shape: f32[1,16], index: 11, kind: input, shape index: {}]   ;;  %s2352_s12 = inlined_call_operand.<no memory space> [shape: f32[1], index: 12, kind: input, shape index: {}]   ;;  %s2353_s13 = inlined_call_operand.vmem [shape: f32[1,16], index: 13, kind: input, shape index: {}]   ;;  %s2354_s14 = inlined_call_operand.vmem [shape: f32[2,16], index: 14, kind: input, shape index: {}]   ;;  %s2355_s15 = inlined_call_operand.vmem [shape: f32[16,16], index: 15, kind: input, shape index: {}]   ;;  %s2356_s16 = inlined_call_operand.vmem [shape: f32[1,16], index: 16, kind: input, shape index: {}]   ;;  %s2357_s17 = inlined_call_operand.vmem [shape: f32[1,16], index: 17, kind: input, shape index: {}]   ;;  %s2358_s18 = inlined_call_operand.vmem [shape: f32[1,16], index: 18, kind: input, shape index: {}]   ;;  %s2359_s19 = inlined_call_operand.vmem [shape: f32[16,4], index: 19, kind: input, shape index: {}]   ;;  %s2360_s20 = inlined_call_operand.vmem [shape: f32[1,4], index: 20, kind: input, shape index: {}]   ;;  %s2361_s21 = inlined_call_operand.hbm [shape: f32[2,4], index: 21, kind: output, shape index: {0}]   ;;  %s2362_s22 = inlined_call_operand.hbm [shape: f32[16,16], index: 22, kind: output, shape index: {1}]  }
   0x1   :  { %2366 = sst [smem:[#allocation19_spill]] %s2340_s0 }
   0x2   :  { %2367 = sst [smem:[#allocation20_spill]] %s2341_s1 }
   0x3   :  { %2368 = sst [smem:[#allocation21_spill]] %s2342_s2 }
   0x4   :  { %2369 = sst [smem:[#allocation22_spill]] %s2343_s3 }
   0x5   :  { %2370 = sst [smem:[#allocation23_spill]] %s2344_s4 }
   0x6   :  { %2371 = sst [smem:[#allocation24_spill]] %s2345_s5 }
   0x7   :  { %2372 = sst [smem:[#allocation25_spill]] %s2346_s6 }
   0x8   :  { %30 = vsyncpa [#allocation5], 0 }
   0x9   :  { %31 = vsyncpa [#allocation7], 0 }
   0xa   :  { %32 = vsyncpa [#allocation10], 0 }
   0xb   :  { %33 = vsyncpa [#allocation6], 0 }
   0xc   :  { %34 = vsyncpa [#allocation13], 0  ;;  %s1890_s3 = smov [#allocation4]   ;;  %s2373_s4 = sld [smem:[#allocation20_spill]] }
   0xd   :  { %s40_s28 = sshll.u32 %s1890_s3, 4  ;;  %s2374_s5 = sld [smem:[#allocation19_spill]]  ;;  %s41_s28 = int_to_ptr.vmem [resolvable:$true] %s40_s28 }
  0x12   :  { %s53_s0 = sshll.u32 %s2373_s4, 4  ;;  %s54_s0 = int_to_ptr.vmem [resolvable:$true] %s53_s0 }
  0x13   :  { %s1790_s24 = scalar_lea.hbm %s2374_s5, 3072 }
  0x14   :  { %p1791_p0 = scmp.ne.s32.totalorder %s2374_s5, %s1790_s24  ;;  %p1794_p1 = scmp.lt.u32.totalorder %s1790_s24, %s2374_s5 }
  0x16   :  { %p1796_p2 = pnand %p1794_p1, %p1791_p0 }
  0x18   :  { %1799 = shalt.err (!%p1796_p2)
}
  0x19   :  { %s1800_s27 = scalar_lea.vmem %s41_s28, 3072  ;;  %p1805_p4 = scmp.lt.s32.totalorder %s41_s28, %s41_s28 }
  0x1a   :  { %p1801_p3 = scmp.ne.s32.totalorder %s41_s28, %s1800_s27  ;;  %p1806_p5 = scmp.lt.s32.totalorder %s1800_s27, %s1800_s27 }
  0x1c   :  { %p1807_p6 = por %p1806_p5, %p1805_p4 }
  0x1e   :  { %p1808_p7 = pnand %p1807_p6, %p1801_p3 }
  0x20   :  { %1811 = shalt.err (!%p1808_p7)
}
  0x21   :  { %s1891_s3 = smov 128   ;;  %s1892_s29 = smov 8  }
  0x22   :  { %46 = dma.hbm_to_vmem [thread:$0]  %s2374_s5, 3072, %s41_s28, [#allocation5], %s1891_s3, %s1891_s3, %s1892_s29  }
  0x23   :  { %s1812_s23 = scalar_lea.vmem %s54_s0, 16  ;;  %p1817_p9 = scmp.lt.s32.totalorder %s54_s0, %s54_s0 }
  0x24   :  { %p1813_p8 = scmp.ne.s32.totalorder %s54_s0, %s1812_s23  ;;  %p1818_p10 = scmp.lt.s32.totalorder %s1812_s23, %s1812_s23 }
  0x26   :  { %p1819_p11 = por %p1818_p10, %p1817_p9 }
  0x28   :  { %p1820_p12 = pnand %p1819_p11, %p1813_p8 }
  0x2a   :  { %1823 = shalt.err (!%p1820_p12)
}
  0x2b   :  { %s1893_s1 = smov [#allocation8]   ;;  %s73_s25 = sshll.u32 %s2347_s7, 4  ;;  %s74_s25 = int_to_ptr.vmem [resolvable:$true] %s73_s25 }
  0x2c   :  { %56 = dma.vmem_to_smem %s54_s0, 16, %s1893_s1, [#allocation7]  }
  0x2d   :  { %s1824_s26 = scalar_lea.vmem %s74_s25, 16  ;;  %p1829_p0 = scmp.lt.s32.totalorder %s74_s25, %s74_s25 }
  0x2e   :  { %p1825_p13 = scmp.ne.s32.totalorder %s74_s25, %s1824_s26  ;;  %p1830_p1 = scmp.lt.s32.totalorder %s1824_s26, %s1824_s26 }
  0x30   :  { %p1831_p2 = por %p1830_p1, %p1829_p0 }
  0x32   :  { %p1832_p3 = pnand %p1831_p2, %p1825_p13 }
  0x34   :  { %1835 = shalt.err (!%p1832_p3)
}
  0x35   :  { %s1894_s28 = smov [#allocation9]  }
  0x36   :  { %76 = dma.vmem_to_smem %s74_s25, 16, %s1894_s28, [#allocation10]  }
  0x37   :  { %1880 = dma.done.wait [#allocation5], 3072  }
  0x38   :  { %1881 = vsyncadd [#allocation5], 4294964224 }
  0x39   :  { %1882 = dma.done.wait [#allocation7], 16  }
  0x3a   :  { %1883 = vsyncadd [#allocation7], 4294967280 }
  0x3b   :  { %1884 = dma.done.wait [#allocation10], 16  }
  0x3c   :  { %1885 = vsyncadd [#allocation10], 4294967280 }
  0x3d   :  { %112 = sfence }
  0x3e   :  { %s2375_s7 = sld [smem:[#allocation23_spill]]  ;;  %s2376_s30 = sld [smem:[#allocation22_spill]]  ;;  %vm279_vm0 = vcmask 64512   ;;  %v1895_v9 = vmov 0.0|0.0   ;;  %vm1896_vm1 = vmmov 0   ;;  %v1897_v10 = vmov 0.0  }
  0x3f   :  { %s2377_s6 = sld [smem:[#allocation24_spill]]  ;;  %s2064_s2 = sld [smem:[#allocation8]]  ;;  %v113_v11 = vld [vmem:[#allocation4] sm:$0xff]  ;;  %v122_v12 = vld [vmem:[#allocation4 + $0x10] sm:$0xff]  ;;  %v114_v30 = vld [vmem:[#allocation4 + $0x8] sm:$0xff]  ;;  %v224_v52 = vlaneseq  ;;  %v1898_v61 = vmov 1  }
  0x40   :  { %s2066_s27 = sld [smem:[#allocation8 + $0x1]]  ;;  %s2070_s4 = sld [smem:[#allocation8 + $0x3]]  ;;  %v131_v13 = vld [vmem:[#allocation4 + $0x20] sm:$0xff]  ;;  %v140_v16 = vld [vmem:[#allocation4 + $0x30] sm:$0xff]  ;;  %v123_v31 = vld [vmem:[#allocation4 + $0x18] sm:$0xff]  ;;  %1752 = vset.pattern.permute.xlu1 %v1898_v61  ;;  %1751 = vset.pattern.permute.xlu0 %v1898_v61  ;;  %vm243_vm5 = vcmask 130048  }
  0x41   :  { %s2072_s23 = sld [smem:[#allocation8 + $0x4]]  ;;  %s2074_s1 = sld [smem:[#allocation8 + $0x5]]  ;;  %v149_v22 = vld [vmem:[#allocation4 + $0x40] sm:$0xff]  ;;  %v158_v26 = vld [vmem:[#allocation4 + $0x50] sm:$0xff]  ;;  %v132_v32 = vld [vmem:[#allocation4 + $0x28] sm:$0xff]  ;;  %vm365_vm7 = vcmask 261120  }
  0x42   :  { %s2076_s24 = sld [smem:[#allocation8 + $0x6]]  ;;  %s2085_s25 = sld [smem:[#allocation8 + $0x8]]  ;;  %v167_v33 = vld [vmem:[#allocation4 + $0x60] sm:$0xff]  ;;  %v141_v37 = vld [vmem:[#allocation4 + $0x38] sm:$0xff]  ;;  %v176_v38 = vld [vmem:[#allocation4 + $0x70] sm:$0xff] }
  0x43   :  { %s2088_s26 = sld [smem:[#allocation8 + $0x9]]  ;;  %s2091_s28 = sld [smem:[#allocation8 + $0xa]]  ;;  %v150_v45 = vld [vmem:[#allocation4 + $0x48] sm:$0xff]  ;;  %v185_v46 = vld [vmem:[#allocation4 + $0x80] sm:$0xff]  ;;  %v159_v53 = vld [vmem:[#allocation4 + $0x58] sm:$0xff] }
  0x44   :  { %v278_v0 = vld [vmem:[%s2375_s7] sm:$0xff]  ;;  %v277_v2 = vld [vmem:[%s2376_s30 + $0x8] sm:$0xff]  ;;  %s2094_s0 = sld [smem:[#allocation8 + $0xb]]  ;;  %v194_v54 = vld [vmem:[#allocation4 + $0x90] sm:$0xff] }
  0x45   :  { %v276_v1 = vld [vmem:[%s2376_s30] sm:$0xff]  ;;  %1598 = vmatprep.subr.mxu0 %v278_v0  ;;  %v362_v4 = vld [vmem:[%s2377_s6 + $0x8] sm:$0xff]  ;;  %v363_v5 = vld [vmem:[%s2377_s6 + $0x10] sm:$0xff]  ;;  %s2068_s30 = sld [smem:[#allocation8 + $0x2]]  ;;  %v116_v14 = vstv %s2064_s2  ;;  %s2378_s2 = sld [smem:[#allocation21_spill]] }
  0x46   :  { %1600 = vmatprep.mubr.msk.f32.mxu0 %vm279_vm0, %v276_v1  ;;  %v361_v3 = vld [vmem:[%s2377_s6] sm:$0xff]  ;;  %1599 = vmatpush3.msra.mxu0 %v278_v0  ;;  %v364_v7 = vld [vmem:[%s2377_s6 + $0x18] sm:$0xff]  ;;  %v125_v15 = vstv %s2066_s27  ;;  %s2080_s6 = sld [smem:[#allocation8 + $0x7]]  ;;  %v117_v17 = vmul.f32 %v116_v14, %v113_v11  ;;  %v143_v20 = vstv %s2070_s4  ;;  %v118_v40 = vmul.f32 %v116_v14, %v114_v30  ;;  %v168_v60 = vld [vmem:[#allocation4 + $0x68] sm:$0xff] }
  0x47   :  { %v1688_v6 = vpack.c.bf16 %v362_v4, %v361_v3  ;;  %1601 = vmatmul.mubr.msk.f32.vlgmr.msra.gmra.mrb[0].mxu0 %vm279_vm0, %v277_v2  ;;  %v1692_v8 = vpack.c.bf16 %v364_v7, %v363_v5  ;;  %1696 = vmatprep.subr.bf16.mxu0 %v1895_v9  ;;  %v126_v18 = vmul.f32 %v125_v15, %v122_v12  ;;  %v152_v23 = vstv %s2072_s23  ;;  %v203_v62 = vld [vmem:[#allocation4 + $0xa0] sm:$0xff]  ;;  %v212_v7 = vld [vmem:[#allocation4 + $0xb0] sm:$0xff]  ;;  %vm1698_vm8 = vmpackc.low %vm365_vm7, %vm365_vm7  ;;  %s2379_s4 = sld [smem:[#allocation25_spill]]  ;;  %s1531_s23 = sld [smem:[#allocation9 + $0x1]] }
  0x48   :  { %1618 = vmatprep.mubr.msk.f32.mxu0 %vm1896_vm1, %v1897_v10  ;;  %v144_v25 = vmul.f32 %v143_v20, %v140_v16  ;;  %v161_v27 = vstv %s2074_s1  ;;  %v153_v29 = vmul.f32 %v152_v23, %v149_v22  ;;  %v170_v34 = vstv %s2076_s24  ;;  %s2162_s1 = sld [smem:[#allocation9]]  ;;  %s1900_s24 = smov 112   ;;  %vm1722_vm15 = vmpackc.low %vm243_vm5, %vm243_vm5 }
  0x49   :  { %1689 = vmatprep.subr.bf16.mxu1 %v1688_v6  ;;  %v128_v24 = vadd.f32 %v126_v18, %v117_v17  ;;  %v162_v36 = vmul.f32 %v161_v27, %v158_v26  ;;  %v127_v41 = vmul.f32 %v125_v15, %v123_v31  ;;  %v171_v44 = vmul.f32 %v170_v34, %v167_v33  ;;  %v186_v15 = vld [vmem:[#allocation4 + $0x88] sm:$0xff]  ;;  %v213_v31 = vld [vmem:[#allocation4 + $0xb8] sm:$0xff] }
  0x4a   :  { %1691 = vmatpush3.bf16.msra.mxu1 %v1688_v6  ;;  %v188_v47 = vstv %s2085_s25  ;;  %v145_v49 = vmul.f32 %v143_v20, %v141_v37  ;;  %v197_v55 = vstv %s2088_s26  ;;  %v154_v57 = vmul.f32 %v152_v23, %v150_v45  ;;  %v177_v6 = vld [vmem:[#allocation4 + $0x78] sm:$0xff] }
  0x4b   :  { %1693 = vmatprep.subr.bf16.mxu1 %v1692_v8  ;;  %v134_v19 = vstv %s2068_s30  ;;  %v129_v48 = vadd.f32 %v127_v41, %v118_v40  ;;  %v189_v59 = vmul.f32 %v188_v47, %v185_v46  ;;  %v206_v63 = vstv %s2091_s28  ;;  %v195_v20 = vld [vmem:[#allocation4 + $0x98] sm:$0xff] }
  0x4c   :  { %v135_v21 = vmul.f32 %v134_v19, %v131_v13  ;;  %v179_v39 = vstv %s2080_s6  ;;  %v136_v42 = vmul.f32 %v134_v19, %v132_v32  ;;  %v163_v1 = vmul.f32 %v161_v27, %v159_v53 }
  0x4d   :  { %v180_v51 = vmul.f32 %v179_v39, %v176_v38  ;;  %v198_v3 = vmul.f32 %v197_v55, %v194_v54  ;;  %v2099_v4 = vshrl.u32 %v224_v52, 7  ;;  %v228_v5 = vand.u32 127, %v224_v52 }
  0x4e   :  { %1695 = vmatpush3.bf16.msra.mxu1 %v1692_v8  ;;  %v137_v28 = vadd.f32 %v135_v21, %v128_v24  ;;  %v138_v56 = vadd.f32 %v136_v42, %v129_v48  ;;  %v215_v8 = vstv %s2094_s0  ;;  %v172_v12 = vmul.f32 %v170_v34, %v168_v60 }
  0x4f   :  { %v207_v14 = vmul.f32 %v206_v63, %v203_v62  ;;  %v181_v17 = vmul.f32 %v179_v39, %v177_v6  ;;  %v216_v19 = vmul.f32 %v215_v8, %v212_v7  ;;  %vm229_vm2 = vcmp.eq.s32.totalorder %v2099_v4, %v228_v5 }
  0x50   :  { %v146_v35 = vadd.f32 %v144_v25, %v137_v28  ;;  %v147_v0 = vadd.f32 %v145_v49, %v138_v56  ;;  %v190_v22 = vmul.f32 %v188_v47, %v186_v15  ;;  %v221_v24 = vstv %s2378_s2  ;;  %v204_v25 = vld [vmem:[#allocation4 + $0xa8] sm:$0xff] }
  0x51   :  { %v2107_v26 = vsel %vm229_vm2, 1.0, %v1897_v10  ;;  %v199_v28 = vmul.f32 %v197_v55, %v195_v20  ;;  %v208_v33 = vmul.f32 %v206_v63, %v204_v25  ;;  %v217_v37 = vmul.f32 %v215_v8, %v213_v31 }
  0x52   :  { %v155_v43 = vadd.f32 %v153_v29, %v146_v35  ;;  %v156_v11 = vadd.f32 %v154_v57, %v147_v0  ;;  %v226_v29 = vadd.s32 8, %v2099_v4  ;;  %v246_v35 = vsub.f32 1.0, %v2107_v26  ;;  %v447_v57 = vld [vmem:[%s2379_s4] sm:$0x3] }
  0x53   :  { %v1899_v60 = vmov 0   ;;  %v533_v20 = vsub.s32 0, %v2099_v4 }
  0x54   :  { %v164_v50 = vadd.f32 %v162_v36, %v155_v43  ;;  %v165_v16 = vadd.f32 %v163_v1, %v156_v11  ;;  %vm230_vm3 = vcmp.eq.s32.totalorder %v226_v29, %v228_v5 }
  0x55   :  { %v2121_v41 = vsel %vm230_vm3, 1.0, %v1897_v10  ;;  %vm1359_vm3 = vcmask 123904  }
  0x56   :  { %v173_v58 = vadd.f32 %v171_v44, %v164_v50  ;;  %v174_v21 = vadd.f32 %v172_v12, %v165_v16  ;;  %v247_v46 = vsub.f32 1.0, %v2121_v41 }
  0x58   :  { %v182_v2 = vadd.f32 %v180_v51, %v173_v58  ;;  %v183_v27 = vadd.f32 %v181_v17, %v174_v21  ;;  %v673_v17 = vstv %s1531_s23 }
  0x5a   :  { %v191_v13 = vadd.f32 %v189_v59, %v182_v2  ;;  %v192_v32 = vadd.f32 %v190_v22, %v183_v27 }
  0x5c   :  { %v200_v18 = vadd.f32 %v198_v3, %v191_v13  ;;  %v201_v36 = vadd.f32 %v199_v28, %v192_v32 }
  0x5e   :  { %v209_v23 = vadd.f32 %v207_v14, %v200_v18  ;;  %v210_v39 = vadd.f32 %v208_v33, %v201_v36  ;;  %v668_v14 = vsub.s32 1, %v2099_v4 }
  0x60   :  { %v218_v30 = vadd.f32 %v216_v19, %v209_v23  ;;  %v219_v42 = vadd.f32 %v217_v37, %v210_v39 }
  0x62   :  { %v2110_v34 = vadd.f32 %v221_v24, %v218_v30  ;;  %v2127_v45 = vadd.f32 %v221_v24, %v219_v42  ;;  %v538_v30 = vstv %s2162_s1  ;;  %s1901_s1 = smov 16  }
  0x64   :  { %vm235_vm4 = vcmp.gt.f32.partialorder %v2110_v34, 0.0  ;;  %vm236_vm6 = vcmp.gt.f32.partialorder %v2127_v45, 0.0 }
  0x65   :  { %v2115_v38 = vsel %vm235_vm4, 1.0, %v1897_v10  ;;  %v2133_v48 = vsel %vm236_vm6, 1.0, %v1897_v10 }
  0x66   :  { %v2118_v40 = vmul.f32 %v2115_v38, %v246_v35  ;;  %v249_v49 = vmul.f32 %v2133_v48, %v247_v46 }
  0x68   :  { %v252_v43 = vsel %vm243_vm5, %v2118_v40, 0.0  ;;  %v250_v44 = vmul.f32 %v2118_v40, %v2110_v34  ;;  %v255_v50 = vsel %vm243_vm5, %v249_v49, 0.0  ;;  %v251_v51 = vmul.f32 %v249_v49, %v2127_v45 }
  0x69   :  { %253 = vadd.xlane.f32.xlu0 %v252_v43  ;;  %v2170_v23 = vadd.f32 %v2121_v41, %v249_v49  ;;  %v2174_v27 = vadd.f32 %v2107_v26, %v2118_v40 }
  0x6a   :  { %v258_v47 = vsel %vm243_vm5, %v250_v44, 0.0  ;;  %v261_v52 = vsel %vm243_vm5, %v251_v51, 0.0 }
  0x6b   :  { %259 = vadd.xlane.f32.xlu1 %v258_v47  ;;  %vm550_vm9 = vcmp.gt.f32.partialorder %v2170_v23, 0.0  ;;  %vm549_vm11 = vcmp.gt.f32.partialorder %v2174_v27, 0.0 }
  0x6d   :  { %256 = vadd.xlane.f32.xlu0 %v255_v50 }
  0x6f   :  { %262 = vadd.xlane.f32.xlu1 %v261_v52 }
  0xf6   :  { %v254_v63 = vpop.xlane.xlu0 %253 }
  0xf7   :  { %v264_v2 = vmax.f32 %v254_v63, 1.0 }
  0xf8   :  { %v260_v3 = vpop.xlane.xlu1 %259 }
  0xfa   :  { %v257_v0 = vpop.xlane.xlu0 %256 }
  0xfb   :  { %v265_v1 = vmax.f32 %v257_v0, 1.0 }
  0xfc   :  { %v263_v6 = vpop.xlane.xlu1 %262 }
  0xfd   :  { %1760 = vrcp.f32 %v265_v1 }
  0xfe   :  { %1762 = vrcp.f32 %v264_v2 }
 0x107   :  { %v1761_v5 = vpop.eup %1760 }
 0x108   :  { %v1763_v7 = vpop.eup %1762  ;;  %v269_v8 = vmul.f32 %v1761_v5, %v263_v6 }
 0x109   :  { %v268_v11 = vmul.f32 %v1763_v7, %v260_v3 }
 0x10a   :  { %v273_v12 = vmul.f32 %v2121_v41, %v269_v8 }
 0x10b   :  { %v272_v13 = vmul.f32 %v2107_v26, %v268_v11 }
 0x10c   :  { %v2160_v15 = vadd.f32 %v273_v12, %v251_v51 }
 0x10d   :  { %v2164_v16 = vadd.f32 %v272_v13, %v250_v44 }
 0x10e   :  { %v675_v19 = vmul.f32 %v673_v17, %v2160_v15  ;;  %v540_v33 = vmul.f32 %v538_v30, %v2160_v15 }
 0x10f   :  { %v674_v22 = vmul.f32 %v673_v17, %v2164_v16  ;;  %v539_v47 = vmul.f32 %v538_v30, %v2164_v16 }
 0x11a   :  { %v2139_v53 = vpop.f32.mrb[0].mxu0 }
 0x11b   :  { %v2141_v54 = vpop.f32.mrb[1].mxu0 }
 0x11c   :  { %v1754_v55 = vpack.i.bf16 %v2139_v53, %v2141_v54  ;;  %v1697_v56 = vpack.c.bf16 %v2139_v53, %v2141_v54  ;;  %1611 = vmatprep.mubr.msk.f32.mxu1 %vm365_vm7, %v2141_v54 }
 0x11d   :  { %1612 = vmatmul.mubr.msk.f32.vlgmr.msra.gmra.mrb[0].mxu1 %vm365_vm7, %v2139_v53 }
 0x11e   :  { %1699 = vmatpush3.bf16.xpose.msk.msra.mxu0 %vm1698_vm8, %v1697_v56  ;;  %1701 = vmatprep.subr.bf16.mxu1 %v1697_v56 }
 0x11f   :  { %1703 = vmatpush3.bf16.msra.mxu1 %v1697_v56 }
 0x125   :  { %1619 = vmatmul.mubr.msk.f32.vlgmr.msra.gmra.mrb[2].mxu0 %vm365_vm7, %v447_v57 }
 0x1f0   :  { %v1613_v58 = vpop.f32.mrb[0].mxu1 }
 0x1f1   :  { %v438_v59 = vpop.f32.mrb[1].mxu1  ;;  %663 = vperm.xlu1 %1752, %v1613_v58  }
 0x1f2   :  { %659 = vperm.xlu0 %1751, %v438_v59  }
 0x1f5   :  { %1753 = vset.pattern.permute.xlu1 %v1899_v60 }
 0x1f6   :  { %528 = vperm.xlu1 %1753, %v1613_v58   ;;  %1759 = vset.pattern.permute.xlu0 %v1899_v60 }
 0x1f8   :  { %v517_v61 = vpop.f32.mrb[2].mxu0 }
 0x1f9   :  { %v1620_v62 = vpop.f32.mrb[3].mxu0  ;;  %v669_v18 = vrot.slane %v517_v61, %v668_v14  ;;  %v534_v31 = vrot.slane %v517_v61, %v533_v20 }
 0x1fa   :  { %523 = vperm.xlu1 %1753, %v438_v59  }
 0x270   :  { %v664_v21 = vpop.permute.xlu1 %663 }
 0x271   :  { %v671_v24 = vadd.f32 %v669_v18, %v664_v21  ;;  %v660_v25 = vpop.permute.xlu0 %659 }
 0x272   :  { %v670_v28 = vadd.f32 %v669_v18, %v660_v25 }
 0x273   :  { %v677_v29 = vadd.f32 %v675_v19, %v671_v24 }
 0x274   :  { %v676_v32 = vadd.f32 %v674_v22, %v670_v28 }
 0x275   :  { %v529_v35 = vpop.permute.xlu1 %528  ;;  %vm679_vm10 = vcmp.gt.f32.partialorder %v677_v29, 0.0  ;;  %v681_v36 = vmul.f32 0.2, %v677_v29 }
 0x276   :  { %v536_v37 = vadd.f32 %v534_v31, %v529_v35  ;;  %vm678_vm12 = vcmp.gt.f32.partialorder %v676_v32, 0.0  ;;  %v680_v26 = vmul.f32 0.2, %v676_v32 }
 0x277   :  { %v683_v39 = vsel %vm679_vm10, %v677_v29, %v681_v36 }
 0x278   :  { %v542_v40 = vadd.f32 %v540_v33, %v536_v37  ;;  %v685_v41 = vsel %vm550_vm9, %v683_v39, -1e+30  ;;  %v682_v42 = vsel %vm678_vm12, %v676_v32, %v680_v26 }
 0x279   :  { %v524_v43 = vpop.permute.xlu1 %523  ;;  %v689_v44 = vsel %vm243_vm5, %v685_v41, -inf  ;;  %v684_v46 = vsel %vm549_vm11, %v682_v42, -1e+30 }
 0x27a   :  { %v535_v49 = vadd.f32 %v534_v31, %v524_v43  ;;  %690 = vmax.xlane.f32.xlu0 %v689_v44  ;;  %v686_v50 = vsel %vm243_vm5, %v684_v46, -inf  ;;  %v546_v52 = vmul.f32 0.2, %v542_v40  ;;  %vm544_vm13 = vcmp.gt.f32.partialorder %v542_v40, 0.0 }
 0x27b   :  { %687 = vmax.xlane.f32.xlu1 %v686_v50 }
 0x27c   :  { %v541_v51 = vadd.f32 %v539_v47, %v535_v49  ;;  %v548_v58 = vsel %vm544_vm13, %v542_v40, %v546_v52  ;;  %v818_v47 = vld [vmem:[%s2349_s9] sm:$0xff]  ;;  %v819_v49 = vld [vmem:[%s2349_s9 + $0x8] sm:$0xff]  ;;  %v821_v52 = vld [vmem:[%s2349_s9 + $0x18] sm:$0xff] }
 0x27d   :  { %v552_v61 = vsel %vm550_vm9, %v548_v58, -1e+30  ;;  %v1708_v50 = vpack.c.bf16 %v819_v49, %v818_v47  ;;  %v904_v58 = vld [vmem:[%s2350_s10 + $0x8] sm:$0xff] }
 0x27e   :  { %vm543_vm14 = vcmp.gt.f32.partialorder %v541_v51, 0.0  ;;  %v545_v56 = vmul.f32 0.2, %v541_v51  ;;  %v556_v62 = vsel %vm243_vm5, %v552_v61, -inf }
 0x27f   :  { %1709 = vmatprep.subr.bf16.mxu1 %v1708_v50 }
 0x280   :  { %v547_v57 = vsel %vm543_vm14, %v541_v51, %v545_v56  ;;  %v820_v51 = vld [vmem:[%s2349_s9 + $0x10] sm:$0xff] }
 0x281   :  { %v551_v59 = vsel %vm549_vm11, %v547_v57, -1e+30  ;;  %v1712_v56 = vpack.c.bf16 %v821_v52, %v820_v51  ;;  %v903_v57 = vld [vmem:[%s2350_s10] sm:$0xff] }
 0x282   :  { %v553_v60 = vsel %vm243_vm5, %v551_v59, -inf }
 0x283   :  { %554 = vmax.xlane.f32.xlu1 %v553_v60 }
 0x287   :  { %557 = vmax.xlane.f32.xlu1 %v556_v62 }
 0x290   :  { %1755 = vrot.lane.b32.xlu0 %v1754_v55, %s1900_s24 }
 0x307   :  { %v691_v63 = vpop.xlane.xlu0 %690 }
 0x308   :  { %v693_v0 = vsub.f32 %v685_v41, %v691_v63  ;;  %v688_v1 = vpop.xlane.xlu1 %687 }
 0x309   :  { %v692_v2 = vsub.f32 %v684_v46, %v688_v1 }
 0x30a   :  { %v696_v3 = vmul.f32 1.442695, %v693_v0  ;;  %v1534_v0 = vld [vmem:[%s2348_s8] ss:$0 sm:$0xff] }
 0x30b   :  { %v694_v5 = vmul.f32 1.442695, %v692_v2  ;;  %v1756_v6 = vpop.permute.xlu0 %1755 }
 0x30c   :  { %1764 = vpow2.f32 %v696_v3  ;;  %v1758_v7 = vunpack.i.h.bf16 %v1756_v6  ;;  %v1757_v8 = vunpack.i.l.bf16 %v1756_v6 }
 0x30d   :  { %1766 = vpow2.f32 %v694_v5 }
 0x30e   :  { %v1704_v11 = vpack.c.bf16 %v1758_v7, %v1757_v8 }
 0x310   :  { %1705 = vmatprep.subr.bf16.mxu0 %v1704_v11  ;;  %v555_v12 = vpop.xlane.xlu1 %554 }
 0x311   :  { %v559_v13 = vsub.f32 %v551_v59, %v555_v12  ;;  %1707 = vmatpush3.bf16.msra.mxu0 %v1704_v11  ;;  %v1716_v59 = vpack.c.bf16 %v904_v58, %v903_v57 }
 0x313   :  { %v561_v14 = vmul.f32 1.442695, %v559_v13  ;;  %1717 = vmatprep.subr.bf16.mxu0 %v1716_v59 }
 0x314   :  { %v558_v17 = vpop.xlane.xlu1 %557 }
 0x315   :  { %1768 = vpow2.f32 %v561_v14  ;;  %v560_v53 = vsub.f32 %v552_v61, %v558_v17  ;;  %v986_v17 = vld [vmem:[%s2351_s11] sm:$0x1] }
 0x316   :  { %v1765_v54 = vpop.eup %1764 }
 0x317   :  { %v1767_v55 = vpop.eup %1766  ;;  %v563_v18 = vmul.f32 1.442695, %v560_v53  ;;  %v699_v22 = vmul.f32 %v1765_v54, %v2170_v23 }
 0x318   :  { %v698_v19 = vmul.f32 %v1767_v55, %v2174_v27 }
 0x319   :  { %1770 = vpow2.f32 %v563_v18  ;;  %v703_v24 = vsel %vm243_vm5, %v699_v22, 0.0 }
 0x31a   :  { %v700_v21 = vsel %vm243_vm5, %v698_v19, 0.0 }
 0x31b   :  { %701 = vadd.xlane.f32.xlu1 %v700_v21  ;;  %v1077_v21 = vstv %s2352_s12 }
 0x31f   :  { %v1769_v25 = vpop.eup %1768  ;;  %704 = vadd.xlane.f32.xlu1 %v703_v24  ;;  %v1079_v24 = vmul.f32 %v1077_v21, %v2160_v15 }
 0x320   :  { %v565_v28 = vmul.f32 %v1769_v25, %v2174_v27 }
 0x322   :  { %v567_v29 = vsel %vm243_vm5, %v565_v28, 0.0 }
 0x323   :  { %v1771_v30 = vpop.eup %1770  ;;  %568 = vadd.xlane.f32.xlu1 %v567_v29  ;;  %v1078_v29 = vmul.f32 %v1077_v21, %v2164_v16 }
 0x324   :  { %v566_v31 = vmul.f32 %v1771_v30, %v2170_v23 }
 0x326   :  { %v570_v32 = vsel %vm243_vm5, %v566_v31, 0.0 }
 0x327   :  { %571 = vadd.xlane.f32.xlu1 %v570_v32 }
 0x3a8   :  { %v702_v33 = vpop.xlane.xlu1 %701 }
 0x3a9   :  { %1772 = vrcp.f32 %v702_v33 }
 0x3ac   :  { %v705_v35 = vpop.xlane.xlu1 %704 }
 0x3ad   :  { %1774 = vrcp.f32 %v705_v35 }
 0x3b0   :  { %v569_v36 = vpop.xlane.xlu1 %568 }
 0x3b1   :  { %1776 = vrcp.f32 %v569_v36 }
 0x3b3   :  { %v1773_v37 = vpop.eup %1772 }
 0x3b4   :  { %v572_v26 = vpop.xlane.xlu1 %571  ;;  %v708_v39 = vmul.f32 %v1773_v37, %v698_v19 }
 0x3b5   :  { %1778 = vrcp.f32 %v572_v26 }
 0x3b6   :  { %1632 = vmatprep.mubr.msk.f32.mxu0 %vm243_vm5, %v708_v39 }
 0x3b7   :  { %v1775_v40 = vpop.eup %1774 }
 0x3b8   :  { %v709_v41 = vmul.f32 %v1775_v40, %v699_v22 }
 0x3ba   :  { %1633 = vmatmul.mubr.msk.f32.vlgmr.msra.gmra.mrb[4].mxu0 %vm243_vm5, %v709_v41 }
 0x3bb   :  { %v1777_v42 = vpop.eup %1776  ;;  %1719 = vmatpush3.bf16.msra.mxu0 %v1716_v59 }
 0x3bc   :  { %v575_v43 = vmul.f32 %v1777_v42, %v565_v28  ;;  %1720 = vmatprep.subr.bf16.mxu0 %v1895_v9 }
 0x3be   :  { %1625 = vmatprep.mubr.msk.f32.mxu1 %vm243_vm5, %v575_v43 }
 0x3bf   :  { %v1779_v44 = vpop.eup %1778 }
 0x3c0   :  { %v576_v46 = vmul.f32 %v1779_v44, %v566_v31 }
 0x3c2   :  { %1626 = vmatmul.mubr.msk.f32.vlgmr.msra.gmra.mrb[2].mxu1 %vm243_vm5, %v576_v46 }
 0x3c3   :  { %1711 = vmatpush3.bf16.msra.mxu1 %v1708_v50 }
 0x3c4   :  { %1713 = vmatprep.subr.bf16.mxu1 %v1712_v56 }
 0x3c7   :  { %1715 = vmatpush3.bf16.msra.mxu1 %v1712_v56 }
 0x48d   :  { %v1634_v60 = vpop.f32.mrb[4].mxu0 }
 0x48e   :  { %801 = vrot.lane.b32.xlu0 %v1634_v60, %s1901_s1  ;;  %v788_v61 = vpop.f32.mrb[5].mxu0 }
 0x48f   :  { %799 = vrot.lane.b32.xlu1 %v788_v61, %s1901_s1 }
 0x495   :  { %v1627_v62 = vpop.f32.mrb[2].mxu1 }
 0x496   :  { %v649_v63 = vpop.f32.mrb[3].mxu1 }
 0x500   :  { %v802_v1 = vpop.permute.xlu0 %801 }
 0x501   :  { %v806_v2 = vsel %vm243_vm5, %v1627_v62, %v802_v1  ;;  %v800_v3 = vpop.permute.xlu1 %799  ;;  %v1542_v62 = vld [vmem:[%s2353_s13] ss:$0 sm:$0xff] }
 0x502   :  { %v815_v5 = vadd.f32 %v1534_v0, %v806_v2  ;;  %v805_v6 = vsel %vm243_vm5, %v649_v63, %v800_v3 }
 0x503   :  { %v814_v7 = vadd.f32 %v1534_v0, %v805_v6 }
 0x504   :  { %v817_v11 = vmax.f32 %v815_v5, 0.0  ;;  %v1202_v5 = vld [vmem:[%s2354_s14] sm:$0x3] }
 0x505   :  { %v816_v8 = vmax.f32 %v814_v7, 0.0 }
 0x507   :  { %1643 = vmatprep.mubr.msk.f32.mxu1 %vm365_vm7, %v816_v8  ;;  %v1546_v8 = vld [vmem:[%s2356_s16] ss:$0 sm:$0xff] }
 0x508   :  { %1644 = vmatmul.mubr.msk.f32.vlgmr.msra.gmra.mrb[4].mxu1 %vm365_vm7, %v817_v11 }
 0x5db   :  { %v1645_v12 = vpop.f32.mrb[4].mxu1 }
 0x5dc   :  { %v894_v13 = vpop.f32.mrb[5].mxu1 }
 0x5dd   :  { %v1721_v14 = vpack.c.bf16 %v1645_v12, %v894_v13  ;;  %1650 = vmatprep.mubr.msk.f32.mxu0 %vm243_vm5, %v894_v13 }
 0x5de   :  { %1651 = vmatmul.mubr.msk.f32.vlgmr.msra.gmra.mrb[6].mxu0 %vm243_vm5, %v1645_v12 }
 0x5df   :  { %1723 = vmatpush3.bf16.xpose.msk.msra.mxu0 %vm1722_vm15, %v1721_v14  ;;  %1725 = vmatprep.subr.bf16.mxu1 %v1721_v14 }
 0x5e0   :  { %1727 = vmatpush3.bf16.msra.mxu1 %v1721_v14  ;;  %1657 = vmatprep.mubr.msk.f32.mxu0 %vm1896_vm1, %v1897_v10 }
 0x5e1   :  { %1728 = vmatprep.subr.bf16.mxu1 %v1895_v9  ;;  %1731 = vmatprep.subr.bf16.mxu0 %v1895_v9 }
 0x5e6   :  { %1658 = vmatmul.mubr.msk.f32.vlgmr.msra.gmra.mrb[8].mxu0 %vm243_vm5, %v986_v17 }
 0x5e7   :  { %1678 = vmatprep.mubr.msk.f32.mxu0 %vm1896_vm1, %v1897_v10 }
 0x6b1   :  { %v1652_v53 = vpop.f32.mrb[6].mxu0 }
 0x6b2   :  { %1067 = vperm.xlu1 %1753, %v1652_v53   ;;  %v977_v54 = vpop.f32.mrb[7].mxu0 }
 0x6b3   :  { %1062 = vperm.xlu0 %1759, %v977_v54  }
 0x6b9   :  { %v1056_v55 = vpop.f32.mrb[8].mxu0 }
 0x6ba   :  { %v1659_v18 = vpop.f32.mrb[9].mxu0  ;;  %v1073_v19 = vrot.slane %v1056_v55, %v533_v20 }
 0x6bb   :  { %v1390_v18 = vld [vmem:[%s2359_s19] sm:$0xff] }
 0x731   :  { %v1068_v22 = vpop.permute.xlu1 %1067 }
 0x732   :  { %v1075_v25 = vadd.f32 %v1073_v19, %v1068_v22  ;;  %v1063_v28 = vpop.permute.xlu0 %1062 }
 0x733   :  { %v1074_v30 = vadd.f32 %v1073_v19, %v1063_v28  ;;  %v1391_v19 = vld [vmem:[%s2359_s19 + $0x8] sm:$0xff]  ;;  %s1902_s19 = smov [#allocation12]  }
 0x734   :  { %v1081_v31 = vadd.f32 %v1079_v24, %v1075_v25  ;;  %v1735_v21 = vpack.c.bf16 %v1391_v19, %v1390_v18  ;;  %s1489_s24 = sshll.u32 %s1902_s19, 4  ;;  %s1490_s24 = int_to_ptr.vmem [resolvable:$true] %s1489_s24 }
 0x735   :  { %v1080_v32 = vadd.f32 %v1078_v29, %v1074_v30  ;;  %v1548_v29 = vld [vmem:[%s2357_s17] ss:$0 sm:$0xff]  ;;  %s1836_s17 = scalar_lea.vmem %s1490_s24, 256  ;;  %p1841_p5 = scmp.lt.s32.totalorder %s1490_s24, %s1490_s24 }
 0x736   :  { %vm1083_vm0 = vcmp.gt.f32.partialorder %v1081_v31, 0.0  ;;  %v1085_v33 = vmul.f32 0.2, %v1081_v31  ;;  %p1837_p4 = scmp.ne.s32.totalorder %s1490_s24, %s1836_s17  ;;  %p1842_p6 = scmp.lt.s32.totalorder %s1836_s17, %s1836_s17 }
 0x737   :  { %vm1082_vm2 = vcmp.gt.f32.partialorder %v1080_v32, 0.0  ;;  %v1084_v35 = vmul.f32 0.2, %v1080_v32 }
 0x738   :  { %v1087_v4 = vsel %vm1083_vm0, %v1081_v31, %v1085_v33  ;;  %v1549_v31 = vld [vmem:[%s2358_s18] ss:$0 sm:$0xff]  ;;  %p1843_p7 = por %p1842_p6, %p1841_p5 }
 0x739   :  { %v1089_v20 = vsel %vm550_vm9, %v1087_v4, -1e+30  ;;  %v1086_v36 = vsel %vm1082_vm2, %v1080_v32, %v1084_v35  ;;  %v241_v35 = vmul.f32 %v2115_v38, %v2110_v34  ;;  %v242_v4 = vmul.f32 %v2133_v48, %v2127_v45 }
 0x73a   :  { %v1093_v37 = vsel %vm243_vm5, %v1089_v20, -inf  ;;  %v1088_v15 = vsel %vm549_vm11, %v1086_v36, -1e+30  ;;  %p1844_p8 = pnand %p1843_p7, %p1837_p4 }
 0x73b   :  { %1094 = vmax.xlane.f32.xlu0 %v1093_v37  ;;  %v1090_v16 = vsel %vm243_vm5, %v1088_v15, -inf  ;;  %244 = vst.msk [vmem:[#allocation12] sm:$0xff] %vm243_vm5, %v241_v35  ;;  %245 = vst.msk [vmem:[#allocation12 + $0x8] sm:$0xff] %vm243_vm5, %v242_v4 }
 0x73c   :  { %1091 = vmax.xlane.f32.xlu1 %v1090_v16 }
 0x7c8   :  { %v1095_v26 = vpop.xlane.xlu0 %1094 }
 0x7c9   :  { %v1097_v39 = vsub.f32 %v1089_v20, %v1095_v26  ;;  %v1092_v40 = vpop.xlane.xlu1 %1091 }
 0x7ca   :  { %v1096_v41 = vsub.f32 %v1088_v15, %v1092_v40 }
 0x7cb   :  { %v1100_v42 = vmul.f32 1.442695, %v1097_v39 }
 0x7cc   :  { %v1098_v43 = vmul.f32 1.442695, %v1096_v41 }
 0x7cd   :  { %1780 = vpow2.f32 %v1100_v42 }
 0x7ce   :  { %1782 = vpow2.f32 %v1098_v43 }
 0x7d7   :  { %v1781_v44 = vpop.eup %1780 }
 0x7d8   :  { %v1783_v46 = vpop.eup %1782  ;;  %v1103_v47 = vmul.f32 %v1781_v44, %v2170_v23  ;;  %v1276_v23 = vld [vmem:[%s2355_s15] sm:$0xff] }
 0x7d9   :  { %v1102_v49 = vmul.f32 %v1783_v46, %v2174_v27  ;;  %v1277_v27 = vld [vmem:[%s2355_s15 + $0x8] sm:$0xff] }
 0x7da   :  { %v1107_v50 = vsel %vm243_vm5, %v1103_v47, 0.0  ;;  %v1732_v61 = vpack.c.bf16 %v1277_v27, %v1276_v23 }
 0x7db   :  { %1108 = vadd.xlane.f32.xlu1 %v1107_v50  ;;  %v1104_v51 = vsel %vm243_vm5, %v1102_v49, 0.0 }
 0x7dc   :  { %1105 = vadd.xlane.f32.xlu0 %v1104_v51  ;;  %1733 = vmatpush3.bf16.msra.mxu0 %v1732_v61 }
 0x868   :  { %v1109_v52 = vpop.xlane.xlu1 %1108 }
 0x869   :  { %1784 = vrcp.f32 %v1109_v52  ;;  %v1106_v56 = vpop.xlane.xlu0 %1105 }
 0x86a   :  { %1786 = vrcp.f32 %v1106_v56 }
 0x873   :  { %v1785_v57 = vpop.eup %1784 }
 0x874   :  { %v1787_v58 = vpop.eup %1786  ;;  %v1113_v60 = vmul.f32 %v1785_v57, %v1103_v47 }
 0x875   :  { %v1112_v59 = vmul.f32 %v1787_v58, %v1102_v49 }
 0x877   :  { %1664 = vmatprep.mubr.msk.f32.mxu1 %vm243_vm5, %v1112_v59 }
 0x878   :  { %1665 = vmatmul.mubr.msk.f32.vlgmr.msra.gmra.mrb[6].mxu1 %vm243_vm5, %v1113_v60 }
 0x879   :  { %1671 = vmatprep.mubr.msk.f32.mxu1 %vm1896_vm1, %v1897_v10 }
 0x94b   :  { %v1666_v63 = vpop.f32.mrb[6].mxu1 }
 0x94c   :  { %v1199_v0 = vadd.f32 %v1666_v63, %v1542_v62  ;;  %v1193_v1 = vpop.f32.mrb[7].mxu1 }
 0x94d   :  { %v1194_v2 = vadd.f32 %v1542_v62, %v1193_v1 }
 0x94f   :  { %v1729_v3 = vpack.c.bf16 %v1199_v0, %v1194_v2 }
 0x951   :  { %1730 = vmatpush3.bf16.msra.mxu1 %v1729_v3 }
 0x952   :  { %1734 = vmatprep.subr.bf16.mxu1 %v1895_v9 }
 0x954   :  { %1672 = vmatmul.mubr.msk.f32.vlgmr.msra.gmra.mrb[8].mxu1 %vm243_vm5, %v1202_v5 }
 0x955   :  { %1685 = vmatprep.mubr.msk.f32.mxu1 %vm1896_vm1, %v1897_v10  ;;  %1736 = vmatpush3.bf16.msra.mxu1 %v1735_v21 }
 0xa27   :  { %v1272_v6 = vpop.f32.mrb[8].mxu1 }
 0xa28   :  { %v1673_v7 = vpop.f32.mrb[9].mxu1  ;;  %1679 = vmatmul.mubr.msk.f32.vlgmr.msra.gmra.mrb[10].mxu0 %vm243_vm5, %v1272_v6 }
 0xafb   :  { %v1354_v11 = vpop.f32.mrb[10].mxu0 }
 0xafc   :  { %v1355_v12 = vadd.f32 %v1546_v8, %v1354_v11  ;;  %v1680_v13 = vpop.f32.mrb[11].mxu0 }
 0xafe   :  { %v1358_v14 = vmax.f32 %v1355_v12, 0.0 }
 0xb00   :  { %v1360_v17 = vsel %vm1359_vm3, %v1358_v14, 0.0 }
 0xb01   :  { %1361 = vadd.xlane.f32.xlu0 %v1360_v17 }
 0xb8e   :  { %v1362_v9 = vpop.xlane.xlu0 %1361 }
 0xb8f   :  { %v1364_v53 = vmul.f32 0.0625, %v1362_v9 }
 0xb91   :  { %v1365_v54 = vsub.f32 %v1358_v14, %v1364_v53 }
 0xb93   :  { %v1366_v55 = vmul.f32 %v1365_v54, %v1365_v54 }
 0xb95   :  { %v1367_v10 = vsel %vm1359_vm3, %v1366_v55, 0.0 }
 0xb96   :  { %1368 = vadd.xlane.f32.xlu1 %v1367_v10 }
 0xc23   :  { %v1369_v22 = vpop.xlane.xlu1 %1368 }
 0xc24   :  { %v1370_v24 = vmul.f32 0.0625, %v1369_v22 }
 0xc26   :  { %v1371_v25 = vadd.f32 1e-05, %v1370_v24 }
 0xc28   :  { %1788 = vrsqrt.f32 %v1371_v25 }
 0xc32   :  { %v1789_v28 = vpop.eup %1788 }
 0xc33   :  { %v1373_v30 = vmul.f32 %v1789_v28, %v1365_v54 }
 0xc35   :  { %v1381_v32 = vmul.f32 %v1548_v29, %v1373_v30 }
 0xc37   :  { %v1389_v33 = vadd.f32 %v1549_v31, %v1381_v32 }
 0xc39   :  { %1686 = vmatmul.mubr.msk.f32.vlgmr.msra.gmra.mrb[10].mxu1 %vm243_vm5, %v1389_v33 }
 0xc3a   :  { %1847 = shalt.err (!%p1844_p8)
}
 0xc3b   :  { %s1848_s10 = scalar_lea.hbm %s2362_s22, 256 }
 0xc3c   :  { %p1849_p9 = scmp.ne.s32.totalorder %s2362_s22, %s1848_s10  ;;  %p1852_p10 = scmp.lt.u32.totalorder %s1848_s10, %s2362_s22 }
 0xc3e   :  { %p1854_p11 = pnand %p1852_p10, %p1849_p9 }
 0xc40   :  { %1857 = shalt.err (!%p1854_p11)
}
 0xc41   :  { %1495 = dma.vmem_to_hbm [thread:$0]  %s1490_s24, 256, %s2362_s22, [#allocation13], %s1891_s3, %s1891_s3, %s1892_s29   ;;  %vm1472_vm1 = vcmask 25600  }
 0xc42   :  { %v1550_v34 = vld [vmem:[%s2360_s20] ss:$0 sm:$0xff]  ;;  %s1903_s7 = smov [#allocation11]  }
 0xc43   :  { %s1480_s2 = sshll.u32 %s1903_s7, 4  ;;  %s1481_s2 = int_to_ptr.vmem [resolvable:$true] %s1480_s2 }
 0xc44   :  { %s1858_s13 = scalar_lea.vmem %s1481_s2, 32  ;;  %p1863_p13 = scmp.lt.s32.totalorder %s1481_s2, %s1481_s2 }
 0xc45   :  { %p1859_p12 = scmp.ne.s32.totalorder %s1481_s2, %s1858_s13  ;;  %p1864_p0 = scmp.lt.s32.totalorder %s1858_s13, %s1858_s13 }
 0xc47   :  { %p1865_p1 = por %p1864_p0, %p1863_p13 }
 0xc49   :  { %p1866_p2 = pnand %p1865_p1, %p1859_p12 }
 0xd0c   :  { %v1468_v38 = vpop.f32.mrb[10].mxu1 }
 0xd0d   :  { %v1469_v45 = vadd.f32 %v1550_v34, %v1468_v38  ;;  %v1687_v48 = vpop.f32.mrb[11].mxu1 }
 0xd0f   :  { %1473 = vst.msk [vmem:[#allocation11] sm:$0x3] %vm1472_vm1, %v1469_v45 }
 0xd10   :  { %1869 = shalt.err (!%p1866_p2)
}
 0xd11   :  { %s1870_s29 = scalar_lea.hbm %s2361_s21, 32 }
 0xd12   :  { %p1871_p3 = scmp.ne.s32.totalorder %s2361_s21, %s1870_s29  ;;  %p1874_p4 = scmp.lt.u32.totalorder %s1870_s29, %s2361_s21 }
 0xd14   :  { %p1876_p5 = pnand %p1874_p4, %p1871_p3 }
 0xd16   :  { %1879 = shalt.err (!%p1876_p5)
}
 0xd17   :  { %1483 = dma.vmem_to_hbm [thread:$0]  %s1481_s2, 32, %s2361_s21, [#allocation6]  }
 0xd18   :  { %1886 = dma.done.wait [#allocation6], 32  }
 0xd19   :  { %1887 = vsyncadd [#allocation6], 4294967264 }
 0xd1a   :  { %1888 = dma.done.wait [#allocation13], 256  }
 0xd1b   :  { %1889 = vsyncadd [#allocation13], 4294967040 }
 0xd1c   :  { %1502 = vsyncpa [#allocation5], 1 }
 0xd1d   :  { %1503 = vsyncpa [#allocation6], 1 }
 0xd1e   :  { %1504 = vsyncpa [#allocation13], 1 }
 0xd1f   :  { %1505 = vsyncpa [#allocation7], 1 }
 0xd20   :  { %1506 = vsyncpa [#allocation10], 1 }

</bundles_post_ra>
